<compile_context>
chip_gen: v7x
topology: tpu7x:2x2x1
jax: 0.10.0
libtpu: 0.0.40
codegen_flags: <defaults>
</compile_context>

<pallas_src>
import numpy as np
import jax
import jax.numpy as jnp
from jax import lax
from jax.experimental import pallas as pl
from jax.experimental.pallas import tpu as pltpu


_VMEM_SPEC = pl.BlockSpec(memory_space=pltpu.MemorySpace.VMEM)
_ALPHA_LANES = 128   # lane-dense alpha slab width (cols 0/1 hold the weights)


def _nbytes(shape, dtype):
    return int(np.prod(shape)) * jnp.dtype(dtype).itemsize


# ---------------------------------------------------------------------------
# Shared attention math (used inside fused kernels)
# ---------------------------------------------------------------------------

def _attention_math(e1, e2, w_att, u_row, out_ref, alpha_ref):
    """AttentionLayer.forward on two f32 embeddings already resident in VMEM.

    e1/e2: [N, D] f32, w_att: [D, Dout] bf16, u_row: [1, Dout] f32.
    Writes combined embedding to out_ref and a lane-dense alpha slab to
    alpha_ref (col 0 = weight of e1, col 1 = weight of e2).
    """
    v1 = jnp.tanh(jnp.dot(e1.astype(jnp.bfloat16), w_att,
                          preferred_element_type=jnp.float32))
    v2 = jnp.tanh(jnp.dot(e2.astype(jnp.bfloat16), w_att,
                          preferred_element_type=jnp.float32))
    # Rank-1 projection v @ u_omega as a VPU multiply + cross-lane reduce
    # (a 1-column MXU matmul would waste 127/255 of the array).
    vu1 = jnp.sum(v1 * u_row, axis=-1, keepdims=True)   # [N, 1]
    vu2 = jnp.sum(v2 * u_row, axis=-1, keepdims=True)   # [N, 1]
    # softmax over 2 entries == sigmoid of the difference; the +1e-6 of the
    # reference cancels exactly inside the softmax.
    a1 = 1.0 / (1.0 + jnp.exp(vu2 - vu1))                # [N, 1]
    a2 = 1.0 - a1

    out_ref[...] = (a1 * e1 + a2 * e2).astype(out_ref.dtype)

    # Lane-dense store: write a full 128-lane slab, caller slices [:, :2].
    lane = lax.broadcasted_iota(jnp.int32, alpha_ref.shape, 1)
    alpha_ref[...] = jnp.where(lane == 0, a1,
                               jnp.where(lane == 1, a2, 0.0)).astype(alpha_ref.dtype)


# ---------------------------------------------------------------------------
# Kernel 1/2: fused per-modality encoder (two adjacencies) + attention
# ---------------------------------------------------------------------------

def _enc_attn_kernel(feat_ref, w_ref, adj_sp_ref, adj_ft_ref,
                     att_w_ref, att_u_ref, emb_ref, alpha_ref):
    # Hoisted shared product: XW = feat @ W computed ONCE, reused by both the
    # spatial-graph and feature-graph aggregations.
    xw = jnp.dot(feat_ref[...], w_ref[...],
                 preferred_element_type=jnp.float32)              # [N, D] f32
    xw_bf = xw.astype(jnp.bfloat16)
    emb_sp = jnp.dot(adj_sp_ref[...], xw_bf,
                     preferred_element_type=jnp.float32)          # [N, D] f32
    emb_ft = jnp.dot(adj_ft_ref[...], xw_bf,
                     preferred_element_type=jnp.float32)          # [N, D] f32
    _attention_math(emb_sp, emb_ft, att_w_ref[...], att_u_ref[...],
                    emb_ref, alpha_ref)


def encode_and_attend(feat, enc_w, adj_sp, adj_ft, att_w, att_u_row):
    n = adj_sp.shape[0]
    d_in = feat.shape[1]
    d = enc_w.shape[1]
    out_shape = (jax.ShapeDtypeStruct((n, d), jnp.float32),
                 jax.ShapeDtypeStruct((n, _ALPHA_LANES), jnp.float32))
    flops = (2 * n * d_in * d          # XW (hoisted, shared)
             + 2 * (2 * n * n * d)     # two adjacency aggregations
             + 2 * (2 * n * d * d)     # attention projections
             + 8 * n * d)              # elementwise epilogue
    bytes_accessed = (_nbytes(feat.shape, feat.dtype)
                      + _nbytes(enc_w.shape, enc_w.dtype)
                      + _nbytes(adj_sp.shape, adj_sp.dtype)
                      + _nbytes(adj_ft.shape, adj_ft.dtype)
                      + _nbytes(att_w.shape, att_w.dtype)
                      + _nbytes(att_u_row.shape, att_u_row.dtype)
                      + sum(_nbytes(s.shape, s.dtype) for s in out_shape))
    emb, alpha_slab = pl.pallas_call(
        _enc_attn_kernel,
        out_shape=out_shape,
        in_specs=[_VMEM_SPEC] * 6,
        out_specs=(_VMEM_SPEC, _VMEM_SPEC),
        cost_estimate=pl.CostEstimate(flops=flops,
                                      transcendentals=2 * n * d + n,
                                      bytes_accessed=bytes_accessed),
    )(feat, enc_w, adj_sp, adj_ft, att_w, att_u_row)
    return emb, alpha_slab[:, :2]


# ---------------------------------------------------------------------------
# Kernel 3: cross-modality attention
# ---------------------------------------------------------------------------

def _cross_attn_kernel(e1_ref, e2_ref, w_ref, u_ref, out_ref, alpha_ref):
    _attention_math(e1_ref[...], e2_ref[...], w_ref[...], u_ref[...],
                    out_ref, alpha_ref)


def cross_attention(emb1, emb2, att_w, att_u_row):
    n, d = emb1.shape
    out_shape = (jax.ShapeDtypeStruct((n, d), jnp.float32),
                 jax.ShapeDtypeStruct((n, _ALPHA_LANES), jnp.float32))
    flops = 2 * (2 * n * d * d) + 8 * n * d
    bytes_accessed = (2 * _nbytes(emb1.shape, emb1.dtype)
                      + _nbytes(att_w.shape, att_w.dtype)
                      + _nbytes(att_u_row.shape, att_u_row.dtype)
                      + sum(_nbytes(s.shape, s.dtype) for s in out_shape))
    out, alpha_slab = pl.pallas_call(
        _cross_attn_kernel,
        out_shape=out_shape,
        in_specs=[_VMEM_SPEC] * 4,
        out_specs=(_VMEM_SPEC, _VMEM_SPEC),
        cost_estimate=pl.CostEstimate(flops=flops,
                                      transcendentals=2 * n * d + n,
                                      bytes_accessed=bytes_accessed),
    )(emb1, emb2, att_w, att_u_row)
    return out, alpha_slab[:, :2]


# ---------------------------------------------------------------------------
# Kernel 4: both decoder GCNs fused (shared LHS, concatenated weights)
# ---------------------------------------------------------------------------

def decode_both(emb, dec_w_cat, adj_sp1, adj_sp2, d_in1):
    n, d = emb.shape
    d_tot = dec_w_cat.shape[1]
    d_in2 = d_tot - d_in1
    out_shape = (jax.ShapeDtypeStruct((n, d_in1), jnp.float32),
                 jax.ShapeDtypeStruct((n, d_in2), jnp.float32))
    flops = 2 * n * d * d_tot + 2 * n * n * d_in1 + 2 * n * n * d_in2
    bytes_accessed = (_nbytes(emb.shape, emb.dtype)
                      + _nbytes(dec_w_cat.shape, dec_w_cat.dtype)
                      + _nbytes(adj_sp1.shape, adj_sp1.dtype)
                      + _nbytes(adj_sp2.shape, adj_sp2.dtype)
                      + sum(_nbytes(s.shape, s.dtype) for s in out_shape))

    def kernel(emb_ref, wcat_ref, adj1_ref, adj2_ref, rec1_ref, rec2_ref):
        emb_bf = emb_ref[...].astype(jnp.bfloat16)
        # One wide MXU matmul for both decoder weight matrices (shared LHS).
        xw = jnp.dot(emb_bf, wcat_ref[...], preferred_element_type=jnp.float32)
        xw1 = xw[:, :d_in1].astype(jnp.bfloat16)
        xw2 = xw[:, d_in1:].astype(jnp.bfloat16)
        rec1_ref[...] = jnp.dot(adj1_ref[...], xw1,
                                preferred_element_type=jnp.float32).astype(rec1_ref.dtype)
        rec2_ref[...] = jnp.dot(adj2_ref[...], xw2,
                                preferred_element_type=jnp.float32).astype(rec2_ref.dtype)

    return pl.pallas_call(
        kernel,
        out_shape=out_shape,
        in_specs=[_VMEM_SPEC] * 4,
        out_specs=(_VMEM_SPEC, _VMEM_SPEC),
        cost_estimate=pl.CostEstimate(flops=flops, transcendentals=0,
                                      bytes_accessed=bytes_accessed),
    )(emb, dec_w_cat, adj_sp1, adj_sp2)


# ---------------------------------------------------------------------------
# Kernel 5: both across-modality reconstruction chains (2 GCNs each)
# ---------------------------------------------------------------------------

def _across_recon_kernel(e1_ref, e2_ref, d2w_ref, e2w_ref, d1w_ref, e1w_ref,
                         adj1_ref, adj2_ref, out1_ref, out2_ref):
    adj1 = adj1_ref[...]
    adj2 = adj2_ref[...]

    def gcn(adj, x, w):
        xw = jnp.dot(x.astype(jnp.bfloat16), w,
                     preferred_element_type=jnp.float32).astype(jnp.bfloat16)
        return jnp.dot(adj, xw, preferred_element_type=jnp.float32)

    # omics1 -> decoder2 -> encoder2 (both using adj_spatial_omics2)
    t1 = gcn(adj2, e1_ref[...], d2w_ref[...])
    out1_ref[...] = gcn(adj2, t1, e2w_ref[...]).astype(out1_ref.dtype)
    # omics2 -> decoder1 -> encoder1 (both using adj_spatial_omics1)
    t2 = gcn(adj1, e2_ref[...], d1w_ref[...])
    out2_ref[...] = gcn(adj1, t2, e1w_ref[...]).astype(out2_ref.dtype)


def across_recon(emb1, emb2, dec2_w, enc2_w, dec1_w, enc1_w, adj_sp1, adj_sp2):
    n, d = emb1.shape
    d_in2, d_out2 = dec2_w.shape[1], enc2_w.shape[1]
    d_in1, d_out1 = dec1_w.shape[1], enc1_w.shape[1]
    out_shape = (jax.ShapeDtypeStruct((n, d_out2), jnp.float32),
                 jax.ShapeDtypeStruct((n, d_out1), jnp.float32))
    flops = (2 * n * d * d_in2 + 2 * n * n * d_in2
             + 2 * n * d_in2 * d_out2 + 2 * n * n * d_out2
             + 2 * n * d * d_in1 + 2 * n * n * d_in1
             + 2 * n * d_in1 * d_out1 + 2 * n * n * d_out1)
    ins = (emb1, emb2, dec2_w, enc2_w, dec1_w, enc1_w, adj_sp1, adj_sp2)
    bytes_accessed = (sum(_nbytes(a.shape, a.dtype) for a in ins)
                      + sum(_nbytes(s.shape, s.dtype) for s in out_shape))
    return pl.pallas_call(
        _across_recon_kernel,
        out_shape=out_shape,
        in_specs=[_VMEM_SPEC] * 8,
        out_specs=(_VMEM_SPEC, _VMEM_SPEC),
        cost_estimate=pl.CostEstimate(flops=flops, transcendentals=0,
                                      bytes_accessed=bytes_accessed),
    )(*ins)


# ---------------------------------------------------------------------------
# Parameter init (xavier_uniform_, deterministic via PRNGKey)
# ---------------------------------------------------------------------------

def xavier_uniform(key, shape):
    fan_in, fan_out = shape
    bound = float(np.sqrt(6.0 / (fan_in + fan_out)))
    return jax.random.uniform(key, shape, jnp.float32, -bound, bound)


def init_params(key, d_in1, d_out1, d_in2, d_out2):
    ks = jax.random.split(key, 10)
    return {
        "enc1_w": xavier_uniform(ks[0], (d_in1, d_out1)),
        "enc2_w": xavier_uniform(ks[1], (d_in2, d_out2)),
        "dec1_w": xavier_uniform(ks[2], (d_out1, d_in1)),
        "dec2_w": xavier_uniform(ks[3], (d_out2, d_in2)),
        "att1_w": xavier_uniform(ks[4], (d_out1, d_out1)),
        "att1_u": xavier_uniform(ks[5], (d_out1, 1)),
        "att2_w": xavier_uniform(ks[6], (d_out2, d_out2)),
        "att2_u": xavier_uniform(ks[7], (d_out2, 1)),
        "attc_w": xavier_uniform(ks[8], (d_out1, d_out2)),
        "attc_u": xavier_uniform(ks[9], (d_out2, 1)),
    }


# ---------------------------------------------------------------------------
# Encoder_overall.forward
# ---------------------------------------------------------------------------

def encoder_overall(params, features_omics1, features_omics2,
                    adj_spatial_omics1, adj_feature_omics1,
                    adj_spatial_omics2, adj_feature_omics2):
    bf = jnp.bfloat16
    # bf16 MXU operands (f32 accumulation inside the kernels); halves the HBM
    # traffic of the dominant N x N adjacency DMAs.
    f1 = features_omics1.astype(bf)
    f2 = features_omics2.astype(bf)
    a_sp1 = adj_spatial_omics1.astype(bf)
    a_ft1 = adj_feature_omics1.astype(bf)
    a_sp2 = adj_spatial_omics2.astype(bf)
    a_ft2 = adj_feature_omics2.astype(bf)
    enc1_w = params["enc1_w"].astype(bf)
    enc2_w = params["enc2_w"].astype(bf)
    dec1_w = params["dec1_w"].astype(bf)
    dec2_w = params["dec2_w"].astype(bf)
    # Shared-LHS decoders: concat the two decoder weights (d_out1 == d_out2 in
    # this module) into one matmul RHS.
    dec_w_cat = jnp.concatenate([params["dec1_w"], params["dec2_w"]],
                                axis=1).astype(bf)
    att1_w = params["att1_w"].astype(bf)
    att2_w = params["att2_w"].astype(bf)
    attc_w = params["attc_w"].astype(bf)
    att1_u = params["att1_u"].T            # [1, D] f32, consumed on the VPU
    att2_u = params["att2_u"].T
    attc_u = params["attc_u"].T

    emb_latent_omics1, alpha_omics1 = encode_and_attend(
        f1, enc1_w, a_sp1, a_ft1, att1_w, att1_u)
    emb_latent_omics2, alpha_omics2 = encode_and_attend(
        f2, enc2_w, a_sp2, a_ft2, att2_w, att2_u)

    emb_latent_combined, alpha_omics_1_2 = cross_attention(
        emb_latent_omics1, emb_latent_omics2, attc_w, attc_u)

    emb_recon_omics1, emb_recon_omics2 = decode_both(
        emb_latent_combined, dec_w_cat, a_sp1, a_sp2,
        d_in1=params["dec1_w"].shape[1])

    emb_latent_omics1_across_recon, emb_latent_omics2_across_recon = across_recon(
        emb_latent_omics1, emb_latent_omics2,
        dec2_w, enc2_w, dec1_w, enc1_w, a_sp1, a_sp2)

    return {
        "emb_latent_omics1": emb_latent_omics1,
        "emb_latent_omics2": emb_latent_omics2,
        "emb_latent_combined": emb_latent_combined,
        "emb_recon_omics1": emb_recon_omics1,
        "emb_recon_omics2": emb_recon_omics2,
        "emb_latent_omics1_across_recon": emb_latent_omics1_across_recon,
        "emb_latent_omics2_across_recon": emb_latent_omics2_across_recon,
        "alpha_omics1": alpha_omics1,
        "alpha_omics2": alpha_omics2,
        "alpha": alpha_omics_1_2,
    }


# ---------------------------------------------------------------------------
# Main
# ---------------------------------------------------------------------------

if __name__ == "__main__":
    # Small shapes: N nodes, two omics feature dims, shared latent dim.
    N = 16
    D_IN1, D_IN2 = 32, 24
    D_OUT = 8  # dim_out_feat_omics1 == dim_out_feat_omics2

    key = jax.random.PRNGKey(0)
    k_param, k_f1, k_f2, k_a1, k_a2, k_a3, k_a4 = jax.random.split(key, 7)

    params = init_params(k_param, D_IN1, D_OUT, D_IN2, D_OUT)

    features_omics1 = jax.random.normal(k_f1, (N, D_IN1), jnp.float32)
    features_omics2 = jax.random.normal(k_f2, (N, D_IN2), jnp.float32)

    def make_adj(k):
        # dense row-normalized "adjacency" standing in for torch sparse adj
        a = jax.random.uniform(k, (N, N), jnp.float32)
        return a / jnp.sum(a, axis=1, keepdims=True)

    adj_spatial_omics1 = make_adj(k_a1)
    adj_feature_omics1 = make_adj(k_a2)
    adj_spatial_omics2 = make_adj(k_a3)
    adj_feature_omics2 = make_adj(k_a4)

    fwd = jax.jit(encoder_overall)
    results = fwd(params, features_omics1, features_omics2,
                  adj_spatial_omics1, adj_feature_omics1,
                  adj_spatial_omics2, adj_feature_omics2)
    results = jax.block_until_ready(results)

    # sanity: expected shapes and valid attention weights
    assert results["emb_latent_combined"].shape == (N, D_OUT)
    assert results["emb_recon_omics1"].shape == (N, D_IN1)
    assert results["emb_recon_omics2"].shape == (N, D_IN2)
    assert results["emb_latent_omics1_across_recon"].shape == (N, D_OUT)
    assert results["emb_latent_omics2_across_recon"].shape == (N, D_OUT)
    assert results["alpha"].shape == (N, 2)
    assert results["alpha_omics1"].shape == (N, 2)
    assert results["alpha_omics2"].shape == (N, 2)
    for k in ("alpha", "alpha_omics1", "alpha_omics2"):
        a = np.asarray(results[k])
        assert np.allclose(a.sum(axis=1), 1.0, atol=1e-5)
        assert np.all(a >= 0.0)
    assert all(np.isfinite(np.asarray(v)).all() for v in results.values())

    print("KERNEL_OK")
</pallas_src>

<mosaic_0001>
module attributes {stable_mosaic.version = 11 : i64} {
  func.func @_enc_attn_kernel(%arg0: memref<16x24xbf16, #tpu.memory_space<vmem>>, %arg1: memref<24x8xbf16, #tpu.memory_space<vmem>>, %arg2: memref<16x16xbf16, #tpu.memory_space<vmem>>, %arg3: memref<16x16xbf16, #tpu.memory_space<vmem>>, %arg4: memref<8x8xbf16, #tpu.memory_space<vmem>>, %arg5: memref<1x8xf32, #tpu.memory_space<vmem>>, %arg6: memref<16x8xf32, #tpu.memory_space<vmem>>, %arg7: memref<16x128xf32, #tpu.memory_space<vmem>>) attributes {dimension_semantics = [], scalar_prefetch = 0 : i64, scratch_operands = 0 : i64, tpu.core_type = #tpu.core_type<tc>} {
    %c0 = arith.constant 0 : index
    %c0_0 = arith.constant 0 : index
    %0 = vector.load %arg0[%c0, %c0_0] : memref<16x24xbf16, #tpu.memory_space<vmem>>, vector<16x24xbf16>
    %c0_1 = arith.constant 0 : index
    %c0_2 = arith.constant 0 : index
    %1 = vector.load %arg1[%c0_1, %c0_2] : memref<24x8xbf16, #tpu.memory_space<vmem>>, vector<24x8xbf16>
    %cst = arith.constant dense<0.000000e+00> : vector<16x8xf32>
    %2 = tpu.matmul %0, %1, %cst {dimension_numbers = #tpu.dot_dimension_numbers<[1], [0], [0], [1], [0, 0, 1, 1], [], []>} : vector<16x24xbf16>, vector<24x8xbf16>, vector<16x8xf32> -> vector<16x8xf32>
    %3 = arith.truncf %2 : vector<16x8xf32> to vector<16x8xbf16>
    %c0_3 = arith.constant 0 : index
    %c0_4 = arith.constant 0 : index
    %4 = vector.load %arg2[%c0_3, %c0_4] : memref<16x16xbf16, #tpu.memory_space<vmem>>, vector<16x16xbf16>
    %cst_5 = arith.constant dense<0.000000e+00> : vector<16x8xf32>
    %5 = tpu.matmul %4, %3, %cst_5 {dimension_numbers = #tpu.dot_dimension_numbers<[1], [0], [0], [1], [0, 0, 1, 1], [], []>} : vector<16x16xbf16>, vector<16x8xbf16>, vector<16x8xf32> -> vector<16x8xf32>
    %c0_6 = arith.constant 0 : index
    %c0_7 = arith.constant 0 : index
    %6 = vector.load %arg3[%c0_6, %c0_7] : memref<16x16xbf16, #tpu.memory_space<vmem>>, vector<16x16xbf16>
    %cst_8 = arith.constant dense<0.000000e+00> : vector<16x8xf32>
    %7 = tpu.matmul %6, %3, %cst_8 {dimension_numbers = #tpu.dot_dimension_numbers<[1], [0], [0], [1], [0, 0, 1, 1], [], []>} : vector<16x16xbf16>, vector<16x8xbf16>, vector<16x8xf32> -> vector<16x8xf32>
    %c0_9 = arith.constant 0 : index
    %c0_10 = arith.constant 0 : index
    %8 = vector.load %arg4[%c0_9, %c0_10] : memref<8x8xbf16, #tpu.memory_space<vmem>>, vector<8x8xbf16>
    %c0_11 = arith.constant 0 : index
    %c0_12 = arith.constant 0 : index
    %9 = vector.load %arg5[%c0_11, %c0_12] : memref<1x8xf32, #tpu.memory_space<vmem>>, vector<1x8xf32>
    %10 = arith.truncf %5 : vector<16x8xf32> to vector<16x8xbf16>
    %cst_13 = arith.constant dense<0.000000e+00> : vector<16x8xf32>
    %11 = tpu.matmul %10, %8, %cst_13 {dimension_numbers = #tpu.dot_dimension_numbers<[1], [0], [0], [1], [0, 0, 1, 1], [], []>} : vector<16x8xbf16>, vector<8x8xbf16>, vector<16x8xf32> -> vector<16x8xf32>
    %12 = math.tanh %11 : vector<16x8xf32>
    %13 = arith.truncf %7 : vector<16x8xf32> to vector<16x8xbf16>
    %cst_14 = arith.constant dense<0.000000e+00> : vector<16x8xf32>
    %14 = tpu.matmul %13, %8, %cst_14 {dimension_numbers = #tpu.dot_dimension_numbers<[1], [0], [0], [1], [0, 0, 1, 1], [], []>} : vector<16x8xbf16>, vector<8x8xbf16>, vector<16x8xf32> -> vector<16x8xf32>
    %15 = math.tanh %14 : vector<16x8xf32>
    %16 = vector.broadcast %9 : vector<1x8xf32> to vector<16x8xf32>
    %17 = arith.mulf %12, %16 : vector<16x8xf32>
    %cst_15 = arith.constant dense<0.000000e+00> : vector<16xf32>
    %18 = vector.multi_reduction <add>, %17, %cst_15 [1] : vector<16x8xf32> to vector<16xf32>
    %19 = vector.shape_cast %18 : vector<16xf32> to vector<16x1xf32>
    %20 = vector.broadcast %9 : vector<1x8xf32> to vector<16x8xf32>
    %21 = arith.mulf %15, %20 : vector<16x8xf32>
    %cst_16 = arith.constant dense<0.000000e+00> : vector<16xf32>
    %22 = vector.multi_reduction <add>, %21, %cst_16 [1] : vector<16x8xf32> to vector<16xf32>
    %23 = vector.shape_cast %22 : vector<16xf32> to vector<16x1xf32>
    %24 = arith.subf %23, %19 : vector<16x1xf32>
    %25 = math.exp %24 : vector<16x1xf32>
    %cst_17 = arith.constant 1.000000e+00 : f32
    %26 = vector.broadcast %cst_17 : f32 to vector<16x1xf32>
    %27 = arith.addf %26, %25 : vector<16x1xf32>
    %cst_18 = arith.constant 1.000000e+00 : f32
    %28 = vector.broadcast %cst_18 : f32 to vector<16x1xf32>
    %29 = arith.divf %28, %27 : vector<16x1xf32>
    %cst_19 = arith.constant 1.000000e+00 : f32
    %30 = vector.broadcast %cst_19 : f32 to vector<16x1xf32>
    %31 = arith.subf %30, %29 : vector<16x1xf32>
    %32 = vector.broadcast %29 : vector<16x1xf32> to vector<16x8xf32>
    %33 = arith.mulf %32, %5 : vector<16x8xf32>
    %34 = vector.broadcast %31 : vector<16x1xf32> to vector<16x8xf32>
    %35 = arith.mulf %34, %7 : vector<16x8xf32>
    %36 = arith.addf %33, %35 : vector<16x8xf32>
    %c0_20 = arith.constant 0 : index
    %c0_21 = arith.constant 0 : index
    %37 = vector.load %arg6[%c0_20, %c0_21] : memref<16x8xf32, #tpu.memory_space<vmem>>, vector<16x8xf32>
    tpu.vector_store %arg6[%c0_20, %c0_21], %36 {strides = array<i32>} : memref<16x8xf32, #tpu.memory_space<vmem>>, vector<16x8xf32>,
    %38 = tpu.iota {dimensions = array<i32: 1>} : vector<16x128xi32>
    %c0_i32 = arith.constant 0 : i32
    %39 = vector.broadcast %c0_i32 : i32 to vector<16x128xi32>
    %40 = arith.cmpi eq, %38, %39 : vector<16x128xi32>
    %c1_i32 = arith.constant 1 : i32
    %41 = vector.broadcast %c1_i32 : i32 to vector<16x128xi32>
    %42 = arith.cmpi eq, %38, %41 : vector<16x128xi32>
    %cst_22 = arith.constant 0.000000e+00 : f32
    %43 = vector.shape_cast %31 : vector<16x1xf32> to vector<16x1xf32>
    %44 = vector.broadcast %43 : vector<16x1xf32> to vector<16x128xf32>
    %45 = vector.broadcast %cst_22 : f32 to vector<16x128xf32>
    %46 = arith.select %42, %44, %45 : vector<16x128xi1>, vector<16x128xf32>
    %47 = vector.shape_cast %29 : vector<16x1xf32> to vector<16x1xf32>
    %48 = vector.broadcast %47 : vector<16x1xf32> to vector<16x128xf32>
    %49 = arith.select %40, %48, %46 : vector<16x128xi1>, vector<16x128xf32>
    %c0_23 = arith.constant 0 : index
    %c0_24 = arith.constant 0 : index
    %50 = vector.load %arg7[%c0_23, %c0_24] : memref<16x128xf32, #tpu.memory_space<vmem>>, vector<16x128xf32>
    tpu.vector_store %arg7[%c0_23, %c0_24], %49 {strides = array<i32>} : memref<16x128xf32, #tpu.memory_space<vmem>>, vector<16x128xf32>,
    return
  }
}

module attributes {stable_mosaic.version = 11 : i64} {
  func.func @_enc_attn_kernel(%arg0: memref<16x32xbf16, #tpu.memory_space<vmem>>, %arg1: memref<32x8xbf16, #tpu.memory_space<vmem>>, %arg2: memref<16x16xbf16, #tpu.memory_space<vmem>>, %arg3: memref<16x16xbf16, #tpu.memory_space<vmem>>, %arg4: memref<8x8xbf16, #tpu.memory_space<vmem>>, %arg5: memref<1x8xf32, #tpu.memory_space<vmem>>, %arg6: memref<16x8xf32, #tpu.memory_space<vmem>>, %arg7: memref<16x128xf32, #tpu.memory_space<vmem>>) attributes {dimension_semantics = [], scalar_prefetch = 0 : i64, scratch_operands = 0 : i64, tpu.core_type = #tpu.core_type<tc>} {
    %c0 = arith.constant 0 : index
    %c0_0 = arith.constant 0 : index
    %0 = vector.load %arg0[%c0, %c0_0] : memref<16x32xbf16, #tpu.memory_space<vmem>>, vector<16x32xbf16>
    %c0_1 = arith.constant 0 : index
    %c0_2 = arith.constant 0 : index
    %1 = vector.load %arg1[%c0_1, %c0_2] : memref<32x8xbf16, #tpu.memory_space<vmem>>, vector<32x8xbf16>
    %cst = arith.constant dense<0.000000e+00> : vector<16x8xf32>
    %2 = tpu.matmul %0, %1, %cst {dimension_numbers = #tpu.dot_dimension_numbers<[1], [0], [0], [1], [0, 0, 1, 1], [], []>} : vector<16x32xbf16>, vector<32x8xbf16>, vector<16x8xf32> -> vector<16x8xf32>
    %3 = arith.truncf %2 : vector<16x8xf32> to vector<16x8xbf16>
    %c0_3 = arith.constant 0 : index
    %c0_4 = arith.constant 0 : index
    %4 = vector.load %arg2[%c0_3, %c0_4] : memref<16x16xbf16, #tpu.memory_space<vmem>>, vector<16x16xbf16>
    %cst_5 = arith.constant dense<0.000000e+00> : vector<16x8xf32>
    %5 = tpu.matmul %4, %3, %cst_5 {dimension_numbers = #tpu.dot_dimension_numbers<[1], [0], [0], [1], [0, 0, 1, 1], [], []>} : vector<16x16xbf16>, vector<16x8xbf16>, vector<16x8xf32> -> vector<16x8xf32>
    %c0_6 = arith.constant 0 : index
    %c0_7 = arith.constant 0 : index
    %6 = vector.load %arg3[%c0_6, %c0_7] : memref<16x16xbf16, #tpu.memory_space<vmem>>, vector<16x16xbf16>
    %cst_8 = arith.constant dense<0.000000e+00> : vector<16x8xf32>
    %7 = tpu.matmul %6, %3, %cst_8 {dimension_numbers = #tpu.dot_dimension_numbers<[1], [0], [0], [1], [0, 0, 1, 1], [], []>} : vector<16x16xbf16>, vector<16x8xbf16>, vector<16x8xf32> -> vector<16x8xf32>
    %c0_9 = arith.constant 0 : index
    %c0_10 = arith.constant 0 : index
    %8 = vector.load %arg4[%c0_9, %c0_10] : memref<8x8xbf16, #tpu.memory_space<vmem>>, vector<8x8xbf16>
    %c0_11 = arith.constant 0 : index
    %c0_12 = arith.constant 0 : index
    %9 = vector.load %arg5[%c0_11, %c0_12] : memref<1x8xf32, #tpu.memory_space<vmem>>, vector<1x8xf32>
    %10 = arith.truncf %5 : vector<16x8xf32> to vector<16x8xbf16>
    %cst_13 = arith.constant dense<0.000000e+00> : vector<16x8xf32>
    %11 = tpu.matmul %10, %8, %cst_13 {dimension_numbers = #tpu.dot_dimension_numbers<[1], [0], [0], [1], [0, 0, 1, 1], [], []>} : vector<16x8xbf16>, vector<8x8xbf16>, vector<16x8xf32> -> vector<16x8xf32>
    %12 = math.tanh %11 : vector<16x8xf32>
    %13 = arith.truncf %7 : vector<16x8xf32> to vector<16x8xbf16>
    %cst_14 = arith.constant dense<0.000000e+00> : vector<16x8xf32>
    %14 = tpu.matmul %13, %8, %cst_14 {dimension_numbers = #tpu.dot_dimension_numbers<[1], [0], [0], [1], [0, 0, 1, 1], [], []>} : vector<16x8xbf16>, vector<8x8xbf16>, vector<16x8xf32> -> vector<16x8xf32>
    %15 = math.tanh %14 : vector<16x8xf32>
    %16 = vector.broadcast %9 : vector<1x8xf32> to vector<16x8xf32>
    %17 = arith.mulf %12, %16 : vector<16x8xf32>
    %cst_15 = arith.constant dense<0.000000e+00> : vector<16xf32>
    %18 = vector.multi_reduction <add>, %17, %cst_15 [1] : vector<16x8xf32> to vector<16xf32>
    %19 = vector.shape_cast %18 : vector<16xf32> to vector<16x1xf32>
    %20 = vector.broadcast %9 : vector<1x8xf32> to vector<16x8xf32>
    %21 = arith.mulf %15, %20 : vector<16x8xf32>
    %cst_16 = arith.constant dense<0.000000e+00> : vector<16xf32>
    %22 = vector.multi_reduction <add>, %21, %cst_16 [1] : vector<16x8xf32> to vector<16xf32>
    %23 = vector.shape_cast %22 : vector<16xf32> to vector<16x1xf32>
    %24 = arith.subf %23, %19 : vector<16x1xf32>
    %25 = math.exp %24 : vector<16x1xf32>
    %cst_17 = arith.constant 1.000000e+00 : f32
    %26 = vector.broadcast %cst_17 : f32 to vector<16x1xf32>
    %27 = arith.addf %26, %25 : vector<16x1xf32>
    %cst_18 = arith.constant 1.000000e+00 : f32
    %28 = vector.broadcast %cst_18 : f32 to vector<16x1xf32>
    %29 = arith.divf %28, %27 : vector<16x1xf32>
    %cst_19 = arith.constant 1.000000e+00 : f32
    %30 = vector.broadcast %cst_19 : f32 to vector<16x1xf32>
    %31 = arith.subf %30, %29 : vector<16x1xf32>
    %32 = vector.broadcast %29 : vector<16x1xf32> to vector<16x8xf32>
    %33 = arith.mulf %32, %5 : vector<16x8xf32>
    %34 = vector.broadcast %31 : vector<16x1xf32> to vector<16x8xf32>
    %35 = arith.mulf %34, %7 : vector<16x8xf32>
    %36 = arith.addf %33, %35 : vector<16x8xf32>
    %c0_20 = arith.constant 0 : index
    %c0_21 = arith.constant 0 : index
    %37 = vector.load %arg6[%c0_20, %c0_21] : memref<16x8xf32, #tpu.memory_space<vmem>>, vector<16x8xf32>
    tpu.vector_store %arg6[%c0_20, %c0_21], %36 {strides = array<i32>} : memref<16x8xf32, #tpu.memory_space<vmem>>, vector<16x8xf32>,
    %38 = tpu.iota {dimensions = array<i32: 1>} : vector<16x128xi32>
    %c0_i32 = arith.constant 0 : i32
    %39 = vector.broadcast %c0_i32 : i32 to vector<16x128xi32>
    %40 = arith.cmpi eq, %38, %39 : vector<16x128xi32>
    %c1_i32 = arith.constant 1 : i32
    %41 = vector.broadcast %c1_i32 : i32 to vector<16x128xi32>
    %42 = arith.cmpi eq, %38, %41 : vector<16x128xi32>
    %cst_22 = arith.constant 0.000000e+00 : f32
    %43 = vector.shape_cast %31 : vector<16x1xf32> to vector<16x1xf32>
    %44 = vector.broadcast %43 : vector<16x1xf32> to vector<16x128xf32>
    %45 = vector.broadcast %cst_22 : f32 to vector<16x128xf32>
    %46 = arith.select %42, %44, %45 : vector<16x128xi1>, vector<16x128xf32>
    %47 = vector.shape_cast %29 : vector<16x1xf32> to vector<16x1xf32>
    %48 = vector.broadcast %47 : vector<16x1xf32> to vector<16x128xf32>
    %49 = arith.select %40, %48, %46 : vector<16x128xi1>, vector<16x128xf32>
    %c0_23 = arith.constant 0 : index
    %c0_24 = arith.constant 0 : index
    %50 = vector.load %arg7[%c0_23, %c0_24] : memref<16x128xf32, #tpu.memory_space<vmem>>, vector<16x128xf32>
    tpu.vector_store %arg7[%c0_23, %c0_24], %49 {strides = array<i32>} : memref<16x128xf32, #tpu.memory_space<vmem>>, vector<16x128xf32>,
    return
  }
}

module attributes {stable_mosaic.version = 11 : i64} {
  func.func @_cross_attn_kernel(%arg0: memref<16x8xf32, #tpu.memory_space<vmem>>, %arg1: memref<16x8xf32, #tpu.memory_space<vmem>>, %arg2: memref<8x8xbf16, #tpu.memory_space<vmem>>, %arg3: memref<1x8xf32, #tpu.memory_space<vmem>>, %arg4: memref<16x8xf32, #tpu.memory_space<vmem>>, %arg5: memref<16x128xf32, #tpu.memory_space<vmem>>) attributes {dimension_semantics = [], scalar_prefetch = 0 : i64, scratch_operands = 0 : i64, tpu.core_type = #tpu.core_type<tc>} {
    %c0 = arith.constant 0 : index
    %c0_0 = arith.constant 0 : index
    %0 = vector.load %arg0[%c0, %c0_0] : memref<16x8xf32, #tpu.memory_space<vmem>>, vector<16x8xf32>
    %c0_1 = arith.constant 0 : index
    %c0_2 = arith.constant 0 : index
    %1 = vector.load %arg1[%c0_1, %c0_2] : memref<16x8xf32, #tpu.memory_space<vmem>>, vector<16x8xf32>
    %c0_3 = arith.constant 0 : index
    %c0_4 = arith.constant 0 : index
    %2 = vector.load %arg2[%c0_3, %c0_4] : memref<8x8xbf16, #tpu.memory_space<vmem>>, vector<8x8xbf16>
    %c0_5 = arith.constant 0 : index
    %c0_6 = arith.constant 0 : index
    %3 = vector.load %arg3[%c0_5, %c0_6] : memref<1x8xf32, #tpu.memory_space<vmem>>, vector<1x8xf32>
    %4 = arith.truncf %0 : vector<16x8xf32> to vector<16x8xbf16>
    %cst = arith.constant dense<0.000000e+00> : vector<16x8xf32>
    %5 = tpu.matmul %4, %2, %cst {dimension_numbers = #tpu.dot_dimension_numbers<[1], [0], [0], [1], [0, 0, 1, 1], [], []>} : vector<16x8xbf16>, vector<8x8xbf16>, vector<16x8xf32> -> vector<16x8xf32>
    %6 = math.tanh %5 : vector<16x8xf32>
    %7 = arith.truncf %1 : vector<16x8xf32> to vector<16x8xbf16>
    %cst_7 = arith.constant dense<0.000000e+00> : vector<16x8xf32>
    %8 = tpu.matmul %7, %2, %cst_7 {dimension_numbers = #tpu.dot_dimension_numbers<[1], [0], [0], [1], [0, 0, 1, 1], [], []>} : vector<16x8xbf16>, vector<8x8xbf16>, vector<16x8xf32> -> vector<16x8xf32>
    %9 = math.tanh %8 : vector<16x8xf32>
    %10 = vector.broadcast %3 : vector<1x8xf32> to vector<16x8xf32>
    %11 = arith.mulf %6, %10 : vector<16x8xf32>
    %cst_8 = arith.constant dense<0.000000e+00> : vector<16xf32>
    %12 = vector.multi_reduction <add>, %11, %cst_8 [1] : vector<16x8xf32> to vector<16xf32>
    %13 = vector.shape_cast %12 : vector<16xf32> to vector<16x1xf32>
    %14 = vector.broadcast %3 : vector<1x8xf32> to vector<16x8xf32>
    %15 = arith.mulf %9, %14 : vector<16x8xf32>
    %cst_9 = arith.constant dense<0.000000e+00> : vector<16xf32>
    %16 = vector.multi_reduction <add>, %15, %cst_9 [1] : vector<16x8xf32> to vector<16xf32>
    %17 = vector.shape_cast %16 : vector<16xf32> to vector<16x1xf32>
    %18 = arith.subf %17, %13 : vector<16x1xf32>
    %19 = math.exp %18 : vector<16x1xf32>
    %cst_10 = arith.constant 1.000000e+00 : f32
    %20 = vector.broadcast %cst_10 : f32 to vector<16x1xf32>
    %21 = arith.addf %20, %19 : vector<16x1xf32>
    %cst_11 = arith.constant 1.000000e+00 : f32
    %22 = vector.broadcast %cst_11 : f32 to vector<16x1xf32>
    %23 = arith.divf %22, %21 : vector<16x1xf32>
    %cst_12 = arith.constant 1.000000e+00 : f32
    %24 = vector.broadcast %cst_12 : f32 to vector<16x1xf32>
    %25 = arith.subf %24, %23 : vector<16x1xf32>
    %26 = vector.broadcast %23 : vector<16x1xf32> to vector<16x8xf32>
    %27 = arith.mulf %26, %0 : vector<16x8xf32>
    %28 = vector.broadcast %25 : vector<16x1xf32> to vector<16x8xf32>
    %29 = arith.mulf %28, %1 : vector<16x8xf32>
    %30 = arith.addf %27, %29 : vector<16x8xf32>
    %c0_13 = arith.constant 0 : index
    %c0_14 = arith.constant 0 : index
    %31 = vector.load %arg4[%c0_13, %c0_14] : memref<16x8xf32, #tpu.memory_space<vmem>>, vector<16x8xf32>
    tpu.vector_store %arg4[%c0_13, %c0_14], %30 {strides = array<i32>} : memref<16x8xf32, #tpu.memory_space<vmem>>, vector<16x8xf32>,
    %32 = tpu.iota {dimensions = array<i32: 1>} : vector<16x128xi32>
    %c0_i32 = arith.constant 0 : i32
    %33 = vector.broadcast %c0_i32 : i32 to vector<16x128xi32>
    %34 = arith.cmpi eq, %32, %33 : vector<16x128xi32>
    %c1_i32 = arith.constant 1 : i32
    %35 = vector.broadcast %c1_i32 : i32 to vector<16x128xi32>
    %36 = arith.cmpi eq, %32, %35 : vector<16x128xi32>
    %cst_15 = arith.constant 0.000000e+00 : f32
    %37 = vector.shape_cast %25 : vector<16x1xf32> to vector<16x1xf32>
    %38 = vector.broadcast %37 : vector<16x1xf32> to vector<16x128xf32>
    %39 = vector.broadcast %cst_15 : f32 to vector<16x128xf32>
    %40 = arith.select %36, %38, %39 : vector<16x128xi1>, vector<16x128xf32>
    %41 = vector.shape_cast %23 : vector<16x1xf32> to vector<16x1xf32>
    %42 = vector.broadcast %41 : vector<16x1xf32> to vector<16x128xf32>
    %43 = arith.select %34, %42, %40 : vector<16x128xi1>, vector<16x128xf32>
    %c0_16 = arith.constant 0 : index
    %c0_17 = arith.constant 0 : index
    %44 = vector.load %arg5[%c0_16, %c0_17] : memref<16x128xf32, #tpu.memory_space<vmem>>, vector<16x128xf32>
    tpu.vector_store %arg5[%c0_16, %c0_17], %43 {strides = array<i32>} : memref<16x128xf32, #tpu.memory_space<vmem>>, vector<16x128xf32>,
    return
  }
}

module attributes {stable_mosaic.version = 11 : i64} {
  func.func @_across_recon_kernel(%arg0: memref<16x8xf32, #tpu.memory_space<vmem>>, %arg1: memref<16x8xf32, #tpu.memory_space<vmem>>, %arg2: memref<8x24xbf16, #tpu.memory_space<vmem>>, %arg3: memref<24x8xbf16, #tpu.memory_space<vmem>>, %arg4: memref<8x32xbf16, #tpu.memory_space<vmem>>, %arg5: memref<32x8xbf16, #tpu.memory_space<vmem>>, %arg6: memref<16x16xbf16, #tpu.memory_space<vmem>>, %arg7: memref<16x16xbf16, #tpu.memory_space<vmem>>, %arg8: memref<16x8xf32, #tpu.memory_space<vmem>>, %arg9: memref<16x8xf32, #tpu.memory_space<vmem>>) attributes {dimension_semantics = [], scalar_prefetch = 0 : i64, scratch_operands = 0 : i64, tpu.core_type = #tpu.core_type<tc>} {
    %c0 = arith.constant 0 : index
    %c0_0 = arith.constant 0 : index
    %0 = vector.load %arg6[%c0, %c0_0] : memref<16x16xbf16, #tpu.memory_space<vmem>>, vector<16x16xbf16>
    %c0_1 = arith.constant 0 : index
    %c0_2 = arith.constant 0 : index
    %1 = vector.load %arg7[%c0_1, %c0_2] : memref<16x16xbf16, #tpu.memory_space<vmem>>, vector<16x16xbf16>
    %c0_3 = arith.constant 0 : index
    %c0_4 = arith.constant 0 : index
    %2 = vector.load %arg0[%c0_3, %c0_4] : memref<16x8xf32, #tpu.memory_space<vmem>>, vector<16x8xf32>
    %c0_5 = arith.constant 0 : index
    %c0_6 = arith.constant 0 : index
    %3 = vector.load %arg2[%c0_5, %c0_6] : memref<8x24xbf16, #tpu.memory_space<vmem>>, vector<8x24xbf16>
    %4 = arith.truncf %2 : vector<16x8xf32> to vector<16x8xbf16>
    %cst = arith.constant dense<0.000000e+00> : vector<16x24xf32>
    %5 = tpu.matmul %4, %3, %cst {dimension_numbers = #tpu.dot_dimension_numbers<[1], [0], [0], [1], [0, 0, 1, 1], [], []>} : vector<16x8xbf16>, vector<8x24xbf16>, vector<16x24xf32> -> vector<16x24xf32>
    %6 = arith.truncf %5 : vector<16x24xf32> to vector<16x24xbf16>
    %cst_7 = arith.constant dense<0.000000e+00> : vector<16x24xf32>
    %7 = tpu.matmul %1, %6, %cst_7 {dimension_numbers = #tpu.dot_dimension_numbers<[1], [0], [0], [1], [0, 0, 1, 1], [], []>} : vector<16x16xbf16>, vector<16x24xbf16>, vector<16x24xf32> -> vector<16x24xf32>
    %c0_8 = arith.constant 0 : index
    %c0_9 = arith.constant 0 : index
    %8 = vector.load %arg3[%c0_8, %c0_9] : memref<24x8xbf16, #tpu.memory_space<vmem>>, vector<24x8xbf16>
    %9 = arith.truncf %7 : vector<16x24xf32> to vector<16x24xbf16>
    %cst_10 = arith.constant dense<0.000000e+00> : vector<16x8xf32>
    %10 = tpu.matmul %9, %8, %cst_10 {dimension_numbers = #tpu.dot_dimension_numbers<[1], [0], [0], [1], [0, 0, 1, 1], [], []>} : vector<16x24xbf16>, vector<24x8xbf16>, vector<16x8xf32> -> vector<16x8xf32>
    %11 = arith.truncf %10 : vector<16x8xf32> to vector<16x8xbf16>
    %cst_11 = arith.constant dense<0.000000e+00> : vector<16x8xf32>
    %12 = tpu.matmul %1, %11, %cst_11 {dimension_numbers = #tpu.dot_dimension_numbers<[1], [0], [0], [1], [0, 0, 1, 1], [], []>} : vector<16x16xbf16>, vector<16x8xbf16>, vector<16x8xf32> -> vector<16x8xf32>
    %c0_12 = arith.constant 0 : index
    %c0_13 = arith.constant 0 : index
    %13 = vector.load %arg8[%c0_12, %c0_13] : memref<16x8xf32, #tpu.memory_space<vmem>>, vector<16x8xf32>
    tpu.vector_store %arg8[%c0_12, %c0_13], %12 {strides = array<i32>} : memref<16x8xf32, #tpu.memory_space<vmem>>, vector<16x8xf32>,
    %c0_14 = arith.constant 0 : index
    %c0_15 = arith.constant 0 : index
    %14 = vector.load %arg1[%c0_14, %c0_15] : memref<16x8xf32, #tpu.memory_space<vmem>>, vector<16x8xf32>
    %c0_16 = arith.constant 0 : index
    %c0_17 = arith.constant 0 : index
    %15 = vector.load %arg4[%c0_16, %c0_17] : memref<8x32xbf16, #tpu.memory_space<vmem>>, vector<8x32xbf16>
    %16 = arith.truncf %14 : vector<16x8xf32> to vector<16x8xbf16>
    %cst_18 = arith.constant dense<0.000000e+00> : vector<16x32xf32>
    %17 = tpu.matmul %16, %15, %cst_18 {dimension_numbers = #tpu.dot_dimension_numbers<[1], [0], [0], [1], [0, 0, 1, 1], [], []>} : vector<16x8xbf16>, vector<8x32xbf16>, vector<16x32xf32> -> vector<16x32xf32>
    %18 = arith.truncf %17 : vector<16x32xf32> to vector<16x32xbf16>
    %cst_19 = arith.constant dense<0.000000e+00> : vector<16x32xf32>
    %19 = tpu.matmul %0, %18, %cst_19 {dimension_numbers = #tpu.dot_dimension_numbers<[1], [0], [0], [1], [0, 0, 1, 1], [], []>} : vector<16x16xbf16>, vector<16x32xbf16>, vector<16x32xf32> -> vector<16x32xf32>
    %c0_20 = arith.constant 0 : index
    %c0_21 = arith.constant 0 : index
    %20 = vector.load %arg5[%c0_20, %c0_21] : memref<32x8xbf16, #tpu.memory_space<vmem>>, vector<32x8xbf16>
    %21 = arith.truncf %19 : vector<16x32xf32> to vector<16x32xbf16>
    %cst_22 = arith.constant dense<0.000000e+00> : vector<16x8xf32>
    %22 = tpu.matmul %21, %20, %cst_22 {dimension_numbers = #tpu.dot_dimension_numbers<[1], [0], [0], [1], [0, 0, 1, 1], [], []>} : vector<16x32xbf16>, vector<32x8xbf16>, vector<16x8xf32> -> vector<16x8xf32>
    %23 = arith.truncf %22 : vector<16x8xf32> to vector<16x8xbf16>
    %cst_23 = arith.constant dense<0.000000e+00> : vector<16x8xf32>
    %24 = tpu.matmul %0, %23, %cst_23 {dimension_numbers = #tpu.dot_dimension_numbers<[1], [0], [0], [1], [0, 0, 1, 1], [], []>} : vector<16x16xbf16>, vector<16x8xbf16>, vector<16x8xf32> -> vector<16x8xf32>
    %c0_24 = arith.constant 0 : index
    %c0_25 = arith.constant 0 : index
    %25 = vector.load %arg9[%c0_24, %c0_25] : memref<16x8xf32, #tpu.memory_space<vmem>>, vector<16x8xf32>
    tpu.vector_store %arg9[%c0_24, %c0_25], %24 {strides = array<i32>} : memref<16x8xf32, #tpu.memory_space<vmem>>, vector<16x8xf32>,
    return
  }
}

module attributes {stable_mosaic.version = 11 : i64} {
  func.func @kernel(%arg0: memref<16x8xf32, #tpu.memory_space<vmem>>, %arg1: memref<8x56xbf16, #tpu.memory_space<vmem>>, %arg2: memref<16x16xbf16, #tpu.memory_space<vmem>>, %arg3: memref<16x16xbf16, #tpu.memory_space<vmem>>, %arg4: memref<16x32xf32, #tpu.memory_space<vmem>>, %arg5: memref<16x24xf32, #tpu.memory_space<vmem>>) attributes {dimension_semantics = [], scalar_prefetch = 0 : i64, scratch_operands = 0 : i64, tpu.core_type = #tpu.core_type<tc>} {
    %c0 = arith.constant 0 : index
    %c0_0 = arith.constant 0 : index
    %0 = vector.load %arg0[%c0, %c0_0] : memref<16x8xf32, #tpu.memory_space<vmem>>, vector<16x8xf32>
    %1 = arith.truncf %0 : vector<16x8xf32> to vector<16x8xbf16>
    %c0_1 = arith.constant 0 : index
    %c0_2 = arith.constant 0 : index
    %2 = vector.load %arg1[%c0_1, %c0_2] : memref<8x56xbf16, #tpu.memory_space<vmem>>, vector<8x56xbf16>
    %cst = arith.constant dense<0.000000e+00> : vector<16x56xf32>
    %3 = tpu.matmul %1, %2, %cst {dimension_numbers = #tpu.dot_dimension_numbers<[1], [0], [0], [1], [0, 0, 1, 1], [], []>} : vector<16x8xbf16>, vector<8x56xbf16>, vector<16x56xf32> -> vector<16x56xf32>
    %4 = vector.extract_strided_slice %3 {offsets = [0, 0], sizes = [16, 32], strides = [1, 1]} : vector<16x56xf32> to vector<16x32xf32>
    %5 = arith.truncf %4 : vector<16x32xf32> to vector<16x32xbf16>
    %6 = vector.extract_strided_slice %3 {offsets = [0, 32], sizes = [16, 24], strides = [1, 1]} : vector<16x56xf32> to vector<16x24xf32>
    %7 = arith.truncf %6 : vector<16x24xf32> to vector<16x24xbf16>
    %c0_3 = arith.constant 0 : index
    %c0_4 = arith.constant 0 : index
    %8 = vector.load %arg2[%c0_3, %c0_4] : memref<16x16xbf16, #tpu.memory_space<vmem>>, vector<16x16xbf16>
    %cst_5 = arith.constant dense<0.000000e+00> : vector<16x32xf32>
    %9 = tpu.matmul %8, %5, %cst_5 {dimension_numbers = #tpu.dot_dimension_numbers<[1], [0], [0], [1], [0, 0, 1, 1], [], []>} : vector<16x16xbf16>, vector<16x32xbf16>, vector<16x32xf32> -> vector<16x32xf32>
    %c0_6 = arith.constant 0 : index
    %c0_7 = arith.constant 0 : index
    %10 = vector.load %arg4[%c0_6, %c0_7] : memref<16x32xf32, #tpu.memory_space<vmem>>, vector<16x32xf32>
    tpu.vector_store %arg4[%c0_6, %c0_7], %9 {strides = array<i32>} : memref<16x32xf32, #tpu.memory_space<vmem>>, vector<16x32xf32>,
    %c0_8 = arith.constant 0 : index
    %c0_9 = arith.constant 0 : index
    %11 = vector.load %arg3[%c0_8, %c0_9] : memref<16x16xbf16, #tpu.memory_space<vmem>>, vector<16x16xbf16>
    %cst_10 = arith.constant dense<0.000000e+00> : vector<16x24xf32>
    %12 = tpu.matmul %11, %7, %cst_10 {dimension_numbers = #tpu.dot_dimension_numbers<[1], [0], [0], [1], [0, 0, 1, 1], [], []>} : vector<16x16xbf16>, vector<16x24xbf16>, vector<16x24xf32> -> vector<16x24xf32>
    %c0_11 = arith.constant 0 : index
    %c0_12 = arith.constant 0 : index
    %13 = vector.load %arg5[%c0_11, %c0_12] : memref<16x24xf32, #tpu.memory_space<vmem>>, vector<16x24xf32>
    tpu.vector_store %arg5[%c0_11, %c0_12], %12 {strides = array<i32>} : memref<16x24xf32, #tpu.memory_space<vmem>>, vector<16x24xf32>,
    return
  }
}

</mosaic_0001>

<bundles_post_ra>
// kernel: encoder_overall.5
= control target key start
LH: loop header
LB: loop body
LE: loop exit
PB: predicated region body
PF: predicated region fallthrough
CT: control target
= control target key end

     0   :  { %v438_v0 = vmov 0.0   ;;  %vm439_vm0 = vmmov 0   ;;  %vm49_vm1 = vcmask 261120   ;;  %vm102_vm2 = vcmask 130048   ;;  %s542_s1 = inlined_call_operand.vmem [shape: bf16[32,8], index: 1, kind: input, shape index: {}]   ;;  %s543_s0 = inlined_call_operand.vmem [shape: bf16[16,32], index: 0, kind: input, shape index: {}]   ;;  %s544_s2 = inlined_call_operand.vmem [shape: bf16[16,16], index: 2, kind: input, shape index: {}]   ;;  %s545_s3 = inlined_call_operand.vmem [shape: bf16[16,16], index: 3, kind: input, shape index: {}]   ;;  %s546_s4 = inlined_call_operand.vmem [shape: bf16[8,8], index: 4, kind: input, shape index: {}]   ;;  %s547_s5 = inlined_call_operand.vmem [shape: f32[1,8], index: 5, kind: input, shape index: {}]   ;;  %s548_s7 = inlined_call_operand.vmem [shape: f32[16,128], index: 7, kind: output, shape index: {1}]   ;;  %s549_s6 = inlined_call_operand.vmem [shape: f32[16,8], index: 6, kind: output, shape index: {0}]  }
   0x1   :  { %383 = vmatprep.subr.bf16.mxu0 %v438_v0  ;;  %v417_v1 = vld [vmem:[%s542_s1] sm:$0xff]   ;;  %387 = vmatprep.mubr.msk.bf16.mxu0 %vm439_vm0, %v438_v0  ;;  %v418_v2 = vld [vmem:[%s542_s1 + $0x8] sm:$0xff]   ;;  %vm205_vm3 = vcmask 1043456   ;;  %vm201_vm4 = vcmask 64512   ;;  %v343_v55 = vlaneseq }
   0x2   :  { %391 = vmatprep.subr.bf16.mxu1 %v438_v0  ;;  %393 = vmatprep.mubr.msk.bf16.mxu1 %vm439_vm0, %v438_v0  ;;  %v419_v3 = vld [vmem:[%s543_s0] sm:$0xff]  }
   0x3   :  { %384 = vmatpush3.bf16.msra.mxu0 %v417_v1  ;;  %v420_v9 = vld [vmem:[%s544_s2] sm:$0xff]   ;;  %v344_v57 = vand.u32 127, %v343_v55 }
   0x4   :  { %385 = vmatprep.subr.bf16.mxu0 %v438_v0  ;;  %v421_v10 = vld [vmem:[%s545_s3] sm:$0xff]  }
   0x5   :  { %v198_v11 = vld [vmem:[%s546_s4] sm:$0xf]  ;;  %vm346_vm5 = vcmp.eq.s32.totalorder %v344_v57, 1  ;;  %vm345_vm6 = vcmp.eq.s32.totalorder %v344_v57, 0 }
   0x6   :  { %v207_v12 = vsel %vm205_vm3, %v198_v11, 0  ;;  %v371_v29 = vld [vmem:[%s547_s5] ss:$0 sm:$0xff] }
   0x7   :  { %386 = vmatpush3.bf16.msra.mxu0 %v418_v2 }
   0x8   :  { %403 = vmatprep.subr.bf16.mxu0 %v438_v0 }
   0xa   :  { %388 = vmatmul.mubr.msk.bf16.vlgmr.msra.gmra.mrb[0].mxu0 %vm49_vm1, %v419_v3 }
   0xb   :  { %405 = vmatprep.mubr.msk.bf16.mxu0 %vm439_vm0, %v438_v0  ;;  %404 = vmatpush3.bf16.msra.mxu0 %v207_v12 }
  0xdd   :  { %v87_v4 = vpop.f32.mrb[0].mxu0 }
  0xde   :  { %v389_v5 = vpop.f32.mrb[1].mxu0 }
  0xdf   :  { %v90_v6 = vpop.f32.mrb[2].mxu0 }
  0xe0   :  { %v94_v7 = vpack.c.bf16 %v90_v6, %v87_v4  ;;  %v390_v8 = vpop.f32.mrb[3].mxu0 }
  0xe2   :  { %392 = vmatpush3.bf16.msra.mxu1 %v94_v7 }
  0xe3   :  { %397 = vmatprep.subr.bf16.mxu1 %v438_v0 }
  0xe5   :  { %394 = vmatmul.mubr.msk.bf16.vlgmr.msra.gmra.mrb[0].mxu1 %vm102_vm2, %v420_v9 }
  0xe6   :  { %398 = vmatpush3.bf16.msra.mxu1 %v94_v7  ;;  %399 = vmatprep.mubr.msk.bf16.mxu1 %vm439_vm0, %v438_v0 }
  0xe7   :  { %409 = vmatprep.subr.bf16.mxu1 %v438_v0 }
  0xed   :  { %400 = vmatmul.mubr.msk.bf16.vlgmr.msra.gmra.mrb[4].mxu1 %vm102_vm2, %v421_v10 }
  0xee   :  { %411 = vmatprep.mubr.msk.bf16.mxu1 %vm439_vm0, %v438_v0  ;;  %410 = vmatpush3.bf16.msra.mxu1 %v207_v12 }
 0x1b8   :  { %v503_v13 = vpop.f32.mrb[0].mxu1 }
 0x1b9   :  { %v395_v14 = vpop.f32.mrb[1].mxu1 }
 0x1ba   :  { %v505_v15 = vpop.f32.mrb[2].mxu1 }
 0x1bb   :  { %v200_v16 = vpack.c.bf16 %v505_v15, %v503_v13  ;;  %v396_v17 = vpop.f32.mrb[3].mxu1 }
 0x1bd   :  { %406 = vmatmul.mubr.msk.bf16.vlgmr.msra.gmra.mrb[4].mxu0 %vm201_vm4, %v200_v16 }
 0x1c0   :  { %v191_v18 = vpop.f32.mrb[4].mxu1 }
 0x1c1   :  { %v401_v19 = vpop.f32.mrb[5].mxu1 }
 0x1c2   :  { %v510_v20 = vpop.f32.mrb[6].mxu1 }
 0x1c3   :  { %v252_v21 = vpack.c.bf16 %v510_v20, %v191_v18  ;;  %v402_v22 = vpop.f32.mrb[7].mxu1 }
 0x1c5   :  { %412 = vmatmul.mubr.msk.bf16.vlgmr.msra.gmra.mrb[8].mxu1 %vm201_vm4, %v252_v21 }
 0x290   :  { %v243_v23 = vpop.f32.mrb[4].mxu0 }
 0x291   :  { %422 = vtanh.f32 %v243_v23  ;;  %v407_v24 = vpop.f32.mrb[5].mxu0 }
 0x292   :  { %v246_v25 = vpop.f32.mrb[6].mxu0 }
 0x293   :  { %424 = vtanh.f32 %v246_v25  ;;  %v408_v26 = vpop.f32.mrb[7].mxu0 }
 0x298   :  { %v290_v27 = vpop.f32.mrb[8].mxu1 }
 0x299   :  { %426 = vtanh.f32 %v290_v27  ;;  %v413_v28 = vpop.f32.mrb[9].mxu1 }
 0x29a   :  { %v293_v30 = vpop.f32.mrb[10].mxu1 }
 0x29b   :  { %v423_v31 = vpop.eup %422  ;;  %428 = vtanh.f32 %v293_v30  ;;  %v414_v32 = vpop.f32.mrb[11].mxu1 }
 0x29c   :  { %v305_v33 = vmul.f32 %v423_v31, %v371_v29 }
 0x29d   :  { %v425_v34 = vpop.eup %424 }
 0x29e   :  { %v307_v35 = vsel %vm201_vm4, %v305_v33, 0.0  ;;  %v306_v36 = vmul.f32 %v425_v34, %v371_v29 }
 0x29f   :  { %308 = vadd.xlane.f32.xlu0 %v307_v35 }
 0x2a0   :  { %v310_v37 = vsel %vm201_vm4, %v306_v36, 0.0 }
 0x2a3   :  { %v427_v38 = vpop.eup %426  ;;  %311 = vadd.xlane.f32.xlu0 %v310_v37 }
 0x2a4   :  { %v313_v39 = vmul.f32 %v427_v38, %v371_v29 }
 0x2a5   :  { %v429_v40 = vpop.eup %428 }
 0x2a6   :  { %v315_v41 = vsel %vm201_vm4, %v313_v39, 0.0  ;;  %v314_v42 = vmul.f32 %v429_v40, %v371_v29 }
 0x2a7   :  { %316 = vadd.xlane.f32.xlu1 %v315_v41 }
 0x2a8   :  { %v318_v43 = vsel %vm201_vm4, %v314_v42, 0.0 }
 0x2ab   :  { %319 = vadd.xlane.f32.xlu1 %v318_v43 }
 0x32c   :  { %v309_v44 = vpop.xlane.xlu0 %308 }
 0x330   :  { %v312_v48 = vpop.xlane.xlu0 %311 }
 0x334   :  { %v317_v45 = vpop.xlane.xlu1 %316 }
 0x335   :  { %v321_v46 = vsub.f32 %v317_v45, %v309_v44 }
 0x337   :  { %v323_v47 = vmul.f32 1.442695, %v321_v46 }
 0x338   :  { %v320_v49 = vpop.xlane.xlu1 %319 }
 0x339   :  { %430 = vpow2.f32 %v323_v47  ;;  %v322_v50 = vsub.f32 %v320_v49, %v312_v48 }
 0x33b   :  { %v325_v51 = vmul.f32 1.442695, %v322_v50 }
 0x33d   :  { %432 = vpow2.f32 %v325_v51 }
 0x343   :  { %v431_v52 = vpop.eup %430 }
 0x344   :  { %v327_v53 = vadd.f32 1.0, %v431_v52 }
 0x346   :  { %434 = vrcp.f32 %v327_v53 }
 0x347   :  { %v433_v54 = vpop.eup %432 }
 0x348   :  { %v328_v56 = vadd.f32 1.0, %v433_v54 }
 0x34a   :  { %436 = vrcp.f32 %v328_v56 }
 0x350   :  { %v435_v58 = vpop.eup %434 }
 0x351   :  { %v333_v59 = vsub.f32 1.0, %v435_v58  ;;  %v335_v60 = vmul.f32 %v435_v58, %v503_v13 }
 0x353   :  { %v337_v61 = vmul.f32 %v333_v59, %v191_v18  ;;  %v347_v62 = vsel %vm346_vm5, %v333_v59, 0.0 }
 0x354   :  { %v437_v63 = vpop.eup %436  ;;  %v349_v0 = vsel %vm345_vm6, %v435_v58, %v347_v62 }
 0x355   :  { %v339_v1 = vadd.f32 %v337_v61, %v335_v60  ;;  %351 = vst [vmem:[%s548_s7] sm:$0xff] %v349_v0  ;;  %v334_v2 = vsub.f32 1.0, %v437_v63  ;;  %v336_v3 = vmul.f32 %v437_v63, %v505_v15 }
 0x357   :  { %341 = vst.msk [vmem:[%s549_s6] sm:$0xff] %vm201_vm4, %v339_v1  ;;  %v338_v4 = vmul.f32 %v334_v2, %v510_v20  ;;  %v348_v5 = vsel %vm346_vm5, %v334_v2, 0.0 }
 0x358   :  { %v350_v6 = vsel %vm345_vm6, %v437_v63, %v348_v5 }
 0x359   :  { %v340_v7 = vadd.f32 %v338_v4, %v336_v3  ;;  %352 = vst [vmem:[%s548_s7 + $0x8] sm:$0xff] %v350_v6 }
 0x35b   :  { %342 = vst.msk [vmem:[%s549_s6 + $0x8] sm:$0xff] %vm201_vm4, %v340_v7 }

// kernel: encoder_overall.6
= control target key start
LH: loop header
LB: loop body
LE: loop exit
PB: predicated region body
PF: predicated region fallthrough
CT: control target
= control target key end

     0   :  { %v437_v0 = vmov 0.0   ;;  %vm49_vm0 = vcmask 1043456   ;;  %vm438_vm1 = vmmov 0   ;;  %vm45_vm2 = vcmask 195584   ;;  %s543_s1 = inlined_call_operand.vmem [shape: bf16[24,8], index: 1, kind: input, shape index: {}]   ;;  %s544_s0 = inlined_call_operand.vmem [shape: bf16[16,24], index: 0, kind: input, shape index: {}]   ;;  %s545_s2 = inlined_call_operand.vmem [shape: bf16[16,16], index: 2, kind: input, shape index: {}]   ;;  %s546_s3 = inlined_call_operand.vmem [shape: bf16[16,16], index: 3, kind: input, shape index: {}]   ;;  %s547_s4 = inlined_call_operand.vmem [shape: bf16[8,8], index: 4, kind: input, shape index: {}]   ;;  %s548_s5 = inlined_call_operand.vmem [shape: f32[1,8], index: 5, kind: input, shape index: {}]   ;;  %s549_s7 = inlined_call_operand.vmem [shape: f32[16,128], index: 7, kind: output, shape index: {1}]   ;;  %s550_s6 = inlined_call_operand.vmem [shape: f32[16,8], index: 6, kind: output, shape index: {0}]  }
   0x1   :  { %382 = vmatprep.subr.bf16.mxu0 %v437_v0  ;;  %v416_v1 = vld [vmem:[%s543_s1] sm:$0xff]   ;;  %386 = vmatprep.mubr.msk.bf16.mxu0 %vm438_vm1, %v437_v0  ;;  %v417_v2 = vld [vmem:[%s543_s1 + $0x8] ss:$0 sps:$4 sm:$0xff]   ;;  %vm102_vm3 = vcmask 130048   ;;  %vm201_vm4 = vcmask 64512   ;;  %v342_v56 = vlaneseq }
   0x2   :  { %390 = vmatprep.subr.bf16.mxu1 %v437_v0  ;;  %392 = vmatprep.mubr.msk.bf16.mxu1 %vm438_vm1, %v437_v0  ;;  %v51_v3 = vsel %vm49_vm0, %v417_v2, 0  ;;  %v418_v4 = vld [vmem:[%s544_s0] sm:$0xff]  }
   0x3   :  { %383 = vmatpush3.bf16.msra.mxu0 %v416_v1  ;;  %v419_v10 = vld [vmem:[%s545_s2] sm:$0xff]   ;;  %v343_v58 = vand.u32 127, %v342_v56 }
   0x4   :  { %384 = vmatprep.subr.bf16.mxu0 %v437_v0  ;;  %v420_v11 = vld [vmem:[%s546_s3] sm:$0xff]  }
   0x5   :  { %v198_v12 = vld [vmem:[%s547_s4] sm:$0xf]  ;;  %vm345_vm5 = vcmp.eq.s32.totalorder %v343_v58, 1  ;;  %vm344_vm6 = vcmp.eq.s32.totalorder %v343_v58, 0 }
   0x6   :  { %v206_v13 = vsel %vm49_vm0, %v198_v12, 0  ;;  %v370_v30 = vld [vmem:[%s548_s5] ss:$0 sm:$0xff] }
   0x7   :  { %385 = vmatpush3.bf16.msra.mxu0 %v51_v3 }
   0x8   :  { %402 = vmatprep.subr.bf16.mxu0 %v437_v0 }
   0xa   :  { %387 = vmatmul.mubr.msk.bf16.vlgmr.msra.gmra.mrb[0].mxu0 %vm45_vm2, %v418_v4 }
   0xb   :  { %404 = vmatprep.mubr.msk.bf16.mxu0 %vm438_vm1, %v437_v0  ;;  %403 = vmatpush3.bf16.msra.mxu0 %v206_v13 }
  0xdd   :  { %v87_v5 = vpop.f32.mrb[0].mxu0 }
  0xde   :  { %v388_v6 = vpop.f32.mrb[1].mxu0 }
  0xdf   :  { %v90_v7 = vpop.f32.mrb[2].mxu0 }
  0xe0   :  { %v94_v8 = vpack.c.bf16 %v90_v7, %v87_v5  ;;  %v389_v9 = vpop.f32.mrb[3].mxu0 }
  0xe2   :  { %391 = vmatpush3.bf16.msra.mxu1 %v94_v8 }
  0xe3   :  { %396 = vmatprep.subr.bf16.mxu1 %v437_v0 }
  0xe5   :  { %393 = vmatmul.mubr.msk.bf16.vlgmr.msra.gmra.mrb[0].mxu1 %vm102_vm3, %v419_v10 }
  0xe6   :  { %397 = vmatpush3.bf16.msra.mxu1 %v94_v8  ;;  %398 = vmatprep.mubr.msk.bf16.mxu1 %vm438_vm1, %v437_v0 }
  0xe7   :  { %408 = vmatprep.subr.bf16.mxu1 %v437_v0 }
  0xed   :  { %399 = vmatmul.mubr.msk.bf16.vlgmr.msra.gmra.mrb[4].mxu1 %vm102_vm3, %v420_v11 }
  0xee   :  { %410 = vmatprep.mubr.msk.bf16.mxu1 %vm438_vm1, %v437_v0  ;;  %409 = vmatpush3.bf16.msra.mxu1 %v206_v13 }
 0x1b8   :  { %v504_v14 = vpop.f32.mrb[0].mxu1 }
 0x1b9   :  { %v394_v15 = vpop.f32.mrb[1].mxu1 }
 0x1ba   :  { %v506_v16 = vpop.f32.mrb[2].mxu1 }
 0x1bb   :  { %v200_v17 = vpack.c.bf16 %v506_v16, %v504_v14  ;;  %v395_v18 = vpop.f32.mrb[3].mxu1 }
 0x1bd   :  { %405 = vmatmul.mubr.msk.bf16.vlgmr.msra.gmra.mrb[4].mxu0 %vm201_vm4, %v200_v17 }
 0x1c0   :  { %v191_v19 = vpop.f32.mrb[4].mxu1 }
 0x1c1   :  { %v400_v20 = vpop.f32.mrb[5].mxu1 }
 0x1c2   :  { %v511_v21 = vpop.f32.mrb[6].mxu1 }
 0x1c3   :  { %v251_v22 = vpack.c.bf16 %v511_v21, %v191_v19  ;;  %v401_v23 = vpop.f32.mrb[7].mxu1 }
 0x1c5   :  { %411 = vmatmul.mubr.msk.bf16.vlgmr.msra.gmra.mrb[8].mxu1 %vm201_vm4, %v251_v22 }
 0x290   :  { %v242_v24 = vpop.f32.mrb[4].mxu0 }
 0x291   :  { %421 = vtanh.f32 %v242_v24  ;;  %v406_v25 = vpop.f32.mrb[5].mxu0 }
 0x292   :  { %v245_v26 = vpop.f32.mrb[6].mxu0 }
 0x293   :  { %423 = vtanh.f32 %v245_v26  ;;  %v407_v27 = vpop.f32.mrb[7].mxu0 }
 0x298   :  { %v289_v28 = vpop.f32.mrb[8].mxu1 }
 0x299   :  { %425 = vtanh.f32 %v289_v28  ;;  %v412_v29 = vpop.f32.mrb[9].mxu1 }
 0x29a   :  { %v292_v31 = vpop.f32.mrb[10].mxu1 }
 0x29b   :  { %v422_v32 = vpop.eup %421  ;;  %427 = vtanh.f32 %v292_v31  ;;  %v413_v33 = vpop.f32.mrb[11].mxu1 }
 0x29c   :  { %v304_v34 = vmul.f32 %v422_v32, %v370_v30 }
 0x29d   :  { %v424_v35 = vpop.eup %423 }
 0x29e   :  { %v306_v36 = vsel %vm201_vm4, %v304_v34, 0.0  ;;  %v305_v37 = vmul.f32 %v424_v35, %v370_v30 }
 0x29f   :  { %307 = vadd.xlane.f32.xlu0 %v306_v36 }
 0x2a0   :  { %v309_v38 = vsel %vm201_vm4, %v305_v37, 0.0 }
 0x2a3   :  { %v426_v39 = vpop.eup %425  ;;  %310 = vadd.xlane.f32.xlu0 %v309_v38 }
 0x2a4   :  { %v312_v40 = vmul.f32 %v426_v39, %v370_v30 }
 0x2a5   :  { %v428_v41 = vpop.eup %427 }
 0x2a6   :  { %v314_v42 = vsel %vm201_vm4, %v312_v40, 0.0  ;;  %v313_v43 = vmul.f32 %v428_v41, %v370_v30 }
 0x2a7   :  { %315 = vadd.xlane.f32.xlu1 %v314_v42 }
 0x2a8   :  { %v317_v44 = vsel %vm201_vm4, %v313_v43, 0.0 }
 0x2ab   :  { %318 = vadd.xlane.f32.xlu1 %v317_v44 }
 0x32c   :  { %v308_v45 = vpop.xlane.xlu0 %307 }
 0x330   :  { %v311_v49 = vpop.xlane.xlu0 %310 }
 0x334   :  { %v316_v46 = vpop.xlane.xlu1 %315 }
 0x335   :  { %v320_v47 = vsub.f32 %v316_v46, %v308_v45 }
 0x337   :  { %v322_v48 = vmul.f32 1.442695, %v320_v47 }
 0x338   :  { %v319_v50 = vpop.xlane.xlu1 %318 }
 0x339   :  { %429 = vpow2.f32 %v322_v48  ;;  %v321_v51 = vsub.f32 %v319_v50, %v311_v49 }
 0x33b   :  { %v324_v52 = vmul.f32 1.442695, %v321_v51 }
 0x33d   :  { %431 = vpow2.f32 %v324_v52 }
 0x343   :  { %v430_v53 = vpop.eup %429 }
 0x344   :  { %v326_v54 = vadd.f32 1.0, %v430_v53 }
 0x346   :  { %433 = vrcp.f32 %v326_v54 }
 0x347   :  { %v432_v55 = vpop.eup %431 }
 0x348   :  { %v327_v57 = vadd.f32 1.0, %v432_v55 }
 0x34a   :  { %435 = vrcp.f32 %v327_v57 }
 0x350   :  { %v434_v59 = vpop.eup %433 }
 0x351   :  { %v332_v60 = vsub.f32 1.0, %v434_v59  ;;  %v334_v61 = vmul.f32 %v434_v59, %v504_v14 }
 0x353   :  { %v336_v62 = vmul.f32 %v332_v60, %v191_v19  ;;  %v346_v63 = vsel %vm345_vm5, %v332_v60, 0.0 }
 0x354   :  { %v436_v0 = vpop.eup %435  ;;  %v348_v1 = vsel %vm344_vm6, %v434_v59, %v346_v63 }
 0x355   :  { %v338_v2 = vadd.f32 %v336_v62, %v334_v61  ;;  %350 = vst [vmem:[%s549_s7] sm:$0xff] %v348_v1  ;;  %v333_v3 = vsub.f32 1.0, %v436_v0  ;;  %v335_v4 = vmul.f32 %v436_v0, %v506_v16 }
 0x357   :  { %340 = vst.msk [vmem:[%s550_s6] sm:$0xff] %vm201_vm4, %v338_v2  ;;  %v337_v5 = vmul.f32 %v333_v3, %v511_v21  ;;  %v347_v6 = vsel %vm345_vm5, %v333_v3, 0.0 }
 0x358   :  { %v349_v7 = vsel %vm344_vm6, %v436_v0, %v347_v6 }
 0x359   :  { %v339_v8 = vadd.f32 %v337_v5, %v335_v4  ;;  %351 = vst [vmem:[%s549_s7 + $0x8] sm:$0xff] %v349_v7 }
 0x35b   :  { %341 = vst.msk [vmem:[%s550_s6 + $0x8] sm:$0xff] %vm201_vm4, %v339_v8 }

// kernel: encoder_overall.7
= control target key start
LH: loop header
LB: loop body
LE: loop exit
PB: predicated region body
PF: predicated region fallthrough
CT: control target
= control target key end

     0   :  { %vm31_vm0 = vcmask 1043456   ;;  %v224_v0 = vmov 0.0   ;;  %vm225_vm1 = vmmov 0   ;;  %vm27_vm2 = vcmask 64512   ;;  %s310_s2 = inlined_call_operand.vmem [shape: bf16[8,8], index: 2, kind: input, shape index: {}]   ;;  %s311_s0 = inlined_call_operand.vmem [shape: f32[16,8], index: 0, kind: input, shape index: {}]   ;;  %s312_s1 = inlined_call_operand.vmem [shape: f32[16,8], index: 1, kind: input, shape index: {}]   ;;  %s313_s3 = inlined_call_operand.vmem [shape: f32[1,8], index: 3, kind: input, shape index: {}]   ;;  %s314_s5 = inlined_call_operand.vmem [shape: f32[16,128], index: 5, kind: output, shape index: {1}]   ;;  %s315_s4 = inlined_call_operand.vmem [shape: f32[16,8], index: 4, kind: output, shape index: {0}]  }
   0x1   :  { %194 = vmatprep.subr.bf16.mxu0 %v224_v0  ;;  %200 = vmatprep.subr.bf16.mxu1 %v224_v0  ;;  %v24_v1 = vld [vmem:[%s310_s2] sm:$0xf]  ;;  %v267_v3 = vld [vmem:[%s311_s0 + $0x8] sm:$0xff]  ;;  %v169_v41 = vlaneseq }
   0x2   :  { %v262_v2 = vld [vmem:[%s311_s0] sm:$0xff]  ;;  %v33_v4 = vsel %vm31_vm0, %v24_v1, 0  ;;  %196 = vmatprep.mubr.msk.bf16.mxu0 %vm225_vm1, %v224_v0  ;;  %202 = vmatprep.mubr.msk.bf16.mxu1 %vm225_vm1, %v224_v0  ;;  %v277_v7 = vld [vmem:[%s312_s1 + $0x8] sm:$0xff] }
   0x3   :  { %v26_v5 = vpack.c.bf16 %v267_v3, %v262_v2  ;;  %v22_v6 = vld [vmem:[%s312_s1] sm:$0xff]  ;;  %195 = vmatpush3.bf16.msra.mxu0 %v33_v4  ;;  %201 = vmatpush3.bf16.msra.mxu1 %v33_v4  ;;  %v170_v43 = vand.u32 127, %v169_v41 }
   0x4   :  { %v78_v8 = vpack.c.bf16 %v277_v7, %v22_v6  ;;  %v189_v17 = vld [vmem:[%s313_s3] ss:$0 sm:$0xff] }
   0x5   :  { %vm172_vm3 = vcmp.eq.s32.totalorder %v170_v43, 1  ;;  %vm171_vm4 = vcmp.eq.s32.totalorder %v170_v43, 0 }
   0x6   :  { %197 = vmatmul.mubr.msk.bf16.vlgmr.msra.gmra.mrb[0].mxu0 %vm27_vm2, %v26_v5  ;;  %203 = vmatmul.mubr.msk.bf16.vlgmr.msra.gmra.mrb[0].mxu1 %vm27_vm2, %v78_v8 }
  0xd9   :  { %v69_v9 = vpop.f32.mrb[0].mxu0  ;;  %v116_v10 = vpop.f32.mrb[0].mxu1 }
  0xda   :  { %208 = vtanh.f32 %v69_v9  ;;  %v198_v11 = vpop.f32.mrb[1].mxu0  ;;  %v204_v12 = vpop.f32.mrb[1].mxu1 }
  0xdb   :  { %210 = vtanh.f32 %v116_v10  ;;  %v72_v13 = vpop.f32.mrb[2].mxu0  ;;  %v119_v14 = vpop.f32.mrb[2].mxu1 }
  0xdc   :  { %212 = vtanh.f32 %v72_v13  ;;  %v199_v15 = vpop.f32.mrb[3].mxu0  ;;  %v205_v16 = vpop.f32.mrb[3].mxu1 }
  0xdd   :  { %214 = vtanh.f32 %v119_v14 }
  0xe4   :  { %v209_v18 = vpop.eup %208 }
  0xe5   :  { %v211_v19 = vpop.eup %210  ;;  %v131_v20 = vmul.f32 %v209_v18, %v189_v17 }
  0xe6   :  { %v213_v21 = vpop.eup %212  ;;  %v139_v22 = vmul.f32 %v211_v19, %v189_v17 }
  0xe7   :  { %v215_v23 = vpop.eup %214  ;;  %v133_v24 = vsel %vm27_vm2, %v131_v20, 0.0  ;;  %v132_v25 = vmul.f32 %v213_v21, %v189_v17 }
  0xe8   :  { %v141_v26 = vsel %vm27_vm2, %v139_v22, 0.0  ;;  %134 = vadd.xlane.f32.xlu0 %v133_v24  ;;  %v140_v27 = vmul.f32 %v215_v23, %v189_v17 }
  0xe9   :  { %142 = vadd.xlane.f32.xlu1 %v141_v26  ;;  %v136_v28 = vsel %vm27_vm2, %v132_v25, 0.0 }
  0xea   :  { %v144_v29 = vsel %vm27_vm2, %v140_v27, 0.0 }
  0xec   :  { %137 = vadd.xlane.f32.xlu0 %v136_v28 }
  0xed   :  { %145 = vadd.xlane.f32.xlu1 %v144_v29 }
 0x175   :  { %v135_v30 = vpop.xlane.xlu0 %134 }
 0x176   :  { %v143_v31 = vpop.xlane.xlu1 %142 }
 0x177   :  { %v147_v32 = vsub.f32 %v143_v31, %v135_v30 }
 0x179   :  { %v149_v33 = vmul.f32 1.442695, %v147_v32  ;;  %v138_v34 = vpop.xlane.xlu0 %137 }
 0x17a   :  { %v146_v35 = vpop.xlane.xlu1 %145 }
 0x17b   :  { %216 = vpow2.f32 %v149_v33  ;;  %v148_v36 = vsub.f32 %v146_v35, %v138_v34 }
 0x17d   :  { %v151_v37 = vmul.f32 1.442695, %v148_v36 }
 0x17f   :  { %218 = vpow2.f32 %v151_v37 }
 0x185   :  { %v217_v38 = vpop.eup %216 }
 0x186   :  { %v153_v39 = vadd.f32 1.0, %v217_v38 }
 0x188   :  { %220 = vrcp.f32 %v153_v39 }
 0x189   :  { %v219_v40 = vpop.eup %218 }
 0x18a   :  { %v154_v42 = vadd.f32 1.0, %v219_v40 }
 0x18c   :  { %222 = vrcp.f32 %v154_v42 }
 0x192   :  { %v221_v44 = vpop.eup %220 }
 0x193   :  { %v159_v45 = vsub.f32 1.0, %v221_v44  ;;  %v161_v46 = vmul.f32 %v221_v44, %v262_v2 }
 0x195   :  { %v163_v47 = vmul.f32 %v159_v45, %v22_v6  ;;  %v173_v48 = vsel %vm172_vm3, %v159_v45, 0.0 }
 0x196   :  { %v223_v49 = vpop.eup %222  ;;  %v175_v50 = vsel %vm171_vm4, %v221_v44, %v173_v48 }
 0x197   :  { %v165_v51 = vadd.f32 %v163_v47, %v161_v46  ;;  %177 = vst [vmem:[%s314_s5] sm:$0xff] %v175_v50  ;;  %v160_v52 = vsub.f32 1.0, %v223_v49  ;;  %v162_v53 = vmul.f32 %v223_v49, %v267_v3 }
 0x199   :  { %167 = vst.msk [vmem:[%s315_s4] sm:$0xff] %vm27_vm2, %v165_v51  ;;  %v164_v54 = vmul.f32 %v160_v52, %v277_v7  ;;  %v174_v55 = vsel %vm172_vm3, %v160_v52, 0.0 }
 0x19a   :  { %v176_v56 = vsel %vm171_vm4, %v223_v49, %v174_v55 }
 0x19b   :  { %v166_v57 = vadd.f32 %v164_v54, %v162_v53  ;;  %178 = vst [vmem:[%s314_s5 + $0x8] sm:$0xff] %v176_v56 }
 0x19d   :  { %168 = vst.msk [vmem:[%s315_s4 + $0x8] sm:$0xff] %vm27_vm2, %v166_v57 }

// kernel: encoder_overall.9
= control target key start
LH: loop header
LB: loop body
LE: loop exit
PB: predicated region body
PF: predicated region fallthrough
CT: control target
= control target key end

     0   :  { %vm44_vm0 = vcmask 1043456   ;;  %v552_v0 = vmov 0.0   ;;  %vm553_vm1 = vmmov 0   ;;  %vm40_vm2 = vcmask 64512   ;;  %s691_s2 = inlined_call_operand.vmem [shape: bf16[8,24], index: 2, kind: input, shape index: {}]   ;;  %s692_s0 = inlined_call_operand.vmem [shape: f32[16,8], index: 0, kind: input, shape index: {}]   ;;  %s693_s7 = inlined_call_operand.vmem [shape: bf16[16,16], index: 7, kind: input, shape index: {}]   ;;  %s694_s3 = inlined_call_operand.vmem [shape: bf16[24,8], index: 3, kind: input, shape index: {}]   ;;  %s695_s4 = inlined_call_operand.vmem [shape: bf16[8,32], index: 4, kind: input, shape index: {}]   ;;  %s696_s1 = inlined_call_operand.vmem [shape: f32[16,8], index: 1, kind: input, shape index: {}]   ;;  %s697_s6 = inlined_call_operand.vmem [shape: bf16[16,16], index: 6, kind: input, shape index: {}]   ;;  %s698_s5 = inlined_call_operand.vmem [shape: bf16[32,8], index: 5, kind: input, shape index: {}]   ;;  %s699_s8 = inlined_call_operand.vmem [shape: f32[16,8], index: 8, kind: output, shape index: {0}]   ;;  %s700_s9 = inlined_call_operand.vmem [shape: f32[16,8], index: 9, kind: output, shape index: {1}]  }
   0x1   :  { %492 = vmatprep.subr.bf16.mxu0 %v552_v0  ;;  %v38_v1 = vld [vmem:[%s691_s2] sm:$0xf]  ;;  %494 = vmatprep.mubr.msk.bf16.mxu0 %vm553_vm1, %v552_v0  ;;  %v37_v3 = vld [vmem:[%s692_s0 + $0x8] sm:$0xff]  ;;  %vm95_vm3 = vcmask 130048   ;;  %vm153_vm4 = vcmask 195584   ;;  %vm363_vm5 = vcmask 261120  }
   0x2   :  { %v36_v2 = vld [vmem:[%s692_s0] sm:$0xff]  ;;  %v46_v4 = vsel %vm44_vm0, %v38_v1, 0  ;;  %498 = vmatprep.subr.bf16.mxu1 %v552_v0  ;;  %500 = vmatprep.mubr.msk.bf16.mxu1 %vm553_vm1, %v552_v0  ;;  %v548_v13 = vld [vmem:[%s694_s3 + $0x8] ss:$0 sps:$4 sm:$0xff]  }
   0x3   :  { %v39_v5 = vpack.c.bf16 %v37_v3, %v36_v2  ;;  %493 = vmatpush3.bf16.msra.mxu0 %v46_v4  ;;  %v547_v6 = vld [vmem:[%s694_s3] sm:$0xff]   ;;  %v158_v14 = vsel %vm44_vm0, %v548_v13, 0  ;;  %v246_v23 = vld [vmem:[%s696_s1 + $0x8] sm:$0xff] }
   0x4   :  { %504 = vmatprep.subr.bf16.mxu0 %v552_v0  ;;  %v546_v12 = vld [vmem:[%s693_s7] sm:$0xff]   ;;  %v551_v37 = vld [vmem:[%s698_s5 + $0x8] sm:$0xff]  }
   0x5   :  { %v247_v16 = vld [vmem:[%s695_s4] sm:$0xf] }
   0x6   :  { %495 = vmatmul.mubr.msk.bf16.vlgmr.msra.gmra.mrb[0].mxu0 %vm40_vm2, %v39_v5  ;;  %v253_v21 = vsel %vm44_vm0, %v247_v16, 0  ;;  %v245_v22 = vld [vmem:[%s696_s1] sm:$0xff] }
   0x7   :  { %508 = vmatprep.mubr.msk.bf16.mxu0 %vm553_vm1, %v552_v0  ;;  %505 = vmatpush3.bf16.msra.mxu0 %v547_v6  ;;  %v248_v24 = vpack.c.bf16 %v246_v23, %v245_v22  ;;  %v549_v35 = vld [vmem:[%s697_s6] sm:$0xff]  }
   0x8   :  { %506 = vmatprep.subr.bf16.mxu0 %v552_v0  ;;  %v550_v36 = vld [vmem:[%s698_s5] sm:$0xff]  }
   0xb   :  { %507 = vmatpush3.bf16.msra.mxu0 %v158_v14 }
   0xc   :  { %518 = vmatprep.subr.bf16.mxu0 %v552_v0 }
  0xd9   :  { %v82_v7 = vpop.f32.mrb[0].mxu0 }
  0xda   :  { %v496_v8 = vpop.f32.mrb[1].mxu0 }
  0xdb   :  { %v85_v9 = vpop.f32.mrb[2].mxu0 }
  0xdc   :  { %v89_v10 = vpack.c.bf16 %v85_v9, %v82_v7  ;;  %v497_v11 = vpop.f32.mrb[3].mxu0 }
  0xde   :  { %499 = vmatpush3.bf16.msra.mxu1 %v89_v10 }
  0xdf   :  { %512 = vmatprep.subr.bf16.mxu1 %v552_v0 }
  0xe1   :  { %501 = vmatmul.mubr.msk.bf16.vlgmr.msra.gmra.mrb[0].mxu1 %vm95_vm3, %v546_v12 }
  0xe2   :  { %514 = vmatprep.mubr.msk.bf16.mxu1 %vm553_vm1, %v552_v0 }
 0x1b4   :  { %v133_v15 = vpop.f32.mrb[0].mxu1 }
 0x1b5   :  { %v502_v17 = vpop.f32.mrb[1].mxu1 }
 0x1b6   :  { %v136_v18 = vpop.f32.mrb[2].mxu1 }
 0x1b7   :  { %v143_v19 = vpack.c.bf16 %v136_v18, %v133_v15  ;;  %v503_v20 = vpop.f32.mrb[3].mxu1 }
 0x1b9   :  { %509 = vmatmul.mubr.msk.bf16.vlgmr.msra.gmra.mrb[4].mxu0 %vm153_vm4, %v143_v19 }
 0x1ba   :  { %519 = vmatpush3.bf16.msra.mxu0 %v253_v21  ;;  %520 = vmatprep.mubr.msk.bf16.mxu0 %vm553_vm1, %v552_v0 }
 0x1bb   :  { %530 = vmatprep.subr.bf16.mxu0 %v552_v0 }
 0x1c1   :  { %521 = vmatmul.mubr.msk.bf16.vlgmr.msra.gmra.mrb[8].mxu0 %vm40_vm2, %v248_v24 }
 0x1c2   :  { %534 = vmatprep.mubr.msk.bf16.mxu0 %vm553_vm1, %v552_v0  ;;  %531 = vmatpush3.bf16.msra.mxu0 %v550_v36 }
 0x1c3   :  { %532 = vmatprep.subr.bf16.mxu0 %v552_v0 }
 0x1c6   :  { %533 = vmatpush3.bf16.msra.mxu0 %v551_v37 }
 0x28c   :  { %v194_v25 = vpop.f32.mrb[4].mxu0 }
 0x28d   :  { %v510_v26 = vpop.f32.mrb[5].mxu0 }
 0x28e   :  { %v197_v27 = vpop.f32.mrb[6].mxu0 }
 0x28f   :  { %v201_v28 = vpack.c.bf16 %v197_v27, %v194_v25  ;;  %v511_v29 = vpop.f32.mrb[7].mxu0 }
 0x291   :  { %513 = vmatpush3.bf16.msra.mxu1 %v201_v28 }
 0x292   :  { %524 = vmatprep.subr.bf16.mxu1 %v552_v0 }
 0x294   :  { %515 = vmatmul.mubr.msk.bf16.vlgmr.msra.gmra.mrb[4].mxu1 %vm95_vm3, %v546_v12  ;;  %v289_v30 = vpop.f32.mrb[8].mxu0 }
 0x295   :  { %v522_v31 = vpop.f32.mrb[9].mxu0  ;;  %526 = vmatprep.mubr.msk.bf16.mxu1 %vm553_vm1, %v552_v0 }
 0x296   :  { %v292_v32 = vpop.f32.mrb[10].mxu0 }
 0x297   :  { %v296_v33 = vpack.c.bf16 %v292_v32, %v289_v30  ;;  %v523_v34 = vpop.f32.mrb[11].mxu0 }
 0x299   :  { %525 = vmatpush3.bf16.msra.mxu1 %v296_v33 }
 0x29a   :  { %538 = vmatprep.subr.bf16.mxu1 %v552_v0 }
 0x29c   :  { %527 = vmatmul.mubr.msk.bf16.vlgmr.msra.gmra.mrb[8].mxu1 %vm95_vm3, %v549_v35 }
 0x29d   :  { %540 = vmatprep.mubr.msk.bf16.mxu1 %vm553_vm1, %v552_v0 }
 0x367   :  { %v236_v38 = vpop.f32.mrb[4].mxu1 }
 0x368   :  { %243 = vst.msk [vmem:[%s699_s8] sm:$0xff] %vm40_vm2, %v236_v38  ;;  %v516_v39 = vpop.f32.mrb[5].mxu1 }
 0x369   :  { %v239_v40 = vpop.f32.mrb[6].mxu1 }
 0x36a   :  { %244 = vst.msk [vmem:[%s699_s8 + $0x8] sm:$0xff] %vm40_vm2, %v239_v40  ;;  %v517_v41 = vpop.f32.mrb[7].mxu1 }
 0x36f   :  { %v339_v42 = vpop.f32.mrb[8].mxu1 }
 0x370   :  { %v528_v43 = vpop.f32.mrb[9].mxu1 }
 0x371   :  { %v342_v44 = vpop.f32.mrb[10].mxu1 }
 0x372   :  { %v350_v45 = vpack.c.bf16 %v342_v44, %v339_v42  ;;  %v529_v46 = vpop.f32.mrb[11].mxu1 }
 0x374   :  { %535 = vmatmul.mubr.msk.bf16.vlgmr.msra.gmra.mrb[12].mxu0 %vm363_vm5, %v350_v45 }
 0x447   :  { %v401_v47 = vpop.f32.mrb[12].mxu0 }
 0x448   :  { %v536_v48 = vpop.f32.mrb[13].mxu0 }
 0x449   :  { %v404_v49 = vpop.f32.mrb[14].mxu0 }
 0x44a   :  { %v408_v50 = vpack.c.bf16 %v404_v49, %v401_v47  ;;  %v537_v51 = vpop.f32.mrb[15].mxu0 }
 0x44c   :  { %539 = vmatpush3.bf16.msra.mxu1 %v408_v50 }
 0x44f   :  { %541 = vmatmul.mubr.msk.bf16.vlgmr.msra.gmra.mrb[12].mxu1 %vm95_vm3, %v549_v35 }
 0x522   :  { %v443_v52 = vpop.f32.mrb[12].mxu1 }
 0x523   :  { %450 = vst.msk [vmem:[%s700_s9] sm:$0xff] %vm40_vm2, %v443_v52  ;;  %v542_v53 = vpop.f32.mrb[13].mxu1 }
 0x524   :  { %v446_v54 = vpop.f32.mrb[14].mxu1 }
 0x525   :  { %451 = vst.msk [vmem:[%s700_s9 + $0x8] sm:$0xff] %vm40_vm2, %v446_v54  ;;  %v543_v55 = vpop.f32.mrb[15].mxu1 }

// kernel: encoder_overall.8
= control target key start
LH: loop header
LB: loop body
LE: loop exit
PB: predicated region body
PF: predicated region fallthrough
CT: control target
= control target key end

     0   :  { %11 = vsyncpa [#allocation3], 0  ;;  %vm30_vm0 = vcmask 1043456   ;;  %v307_v2 = vmov 0.0   ;;  %vm308_vm1 = vmmov 0   ;;  %vm26_vm2 = vcmask 64512   ;;  %s383_s0 = inlined_call_operand.vmem [shape: f32[16,8], index: 0, kind: input, shape index: {}]   ;;  %s384_s1 = inlined_call_operand.vmem [shape: bf16[8,56], index: 1, kind: input, shape index: {}]   ;;  %s385_s2 = inlined_call_operand.vmem [shape: bf16[16,16], index: 2, kind: input, shape index: {}]   ;;  %s386_s3 = inlined_call_operand.vmem [shape: bf16[16,16], index: 3, kind: input, shape index: {}]   ;;  %s387_s4 = inlined_call_operand.hbm [shape: f32[16,32], index: 4, kind: output, shape index: {0}]   ;;  %s388_s5 = inlined_call_operand.hbm [shape: f32[16,24], index: 5, kind: output, shape index: {1}]  }
   0x1   :  { %v25_v0 = vld [vmem:[%s384_s1] sm:$0xf]  ;;  %232 = vmatprep.subr.bf16.mxu0 %v307_v2  ;;  %234 = vmatprep.mubr.msk.bf16.mxu0 %vm308_vm1, %v307_v2  ;;  %v23_v4 = vld [vmem:[%s383_s0 + $0x8] sm:$0xff] }
   0x2   :  { %v22_v1 = vld [vmem:[%s383_s0] sm:$0xff]  ;;  %v32_v3 = vsel %vm30_vm0, %v25_v0, 0  ;;  %238 = vmatprep.subr.bf16.mxu1 %v307_v2  ;;  %240 = vmatprep.mubr.msk.bf16.mxu1 %vm308_vm1, %v307_v2 }
   0x3   :  { %233 = vmatpush3.bf16.msra.mxu0 %v32_v3  ;;  %v24_v5 = vpack.c.bf16 %v23_v4, %v22_v1 }
   0x4   :  { %244 = vmatprep.subr.bf16.mxu0 %v307_v2 }
   0x5   :  { %12 = vsyncpa [#allocation5], 0  ;;  %v257_v11 = vld [vmem:[%s385_s2] sm:$0xff]   ;;  %s309_s0 = smov 96   ;;  %vm83_vm3 = vcmask 130048   ;;  %s310_s27 = smov [#allocation2]  }
   0x6   :  { %235 = vmatmul.mubr.msk.bf16.vlgmr.msra.gmra.mrb[0].mxu0 %vm26_vm2, %v24_v5  ;;  %v258_v13 = vld [vmem:[%s386_s3] sm:$0xff]   ;;  %s194_s28 = sshll.u32 %s310_s27, 4  ;;  %vm128_vm4 = vcmask 261120   ;;  %s195_s28 = int_to_ptr.vmem [resolvable:$true] %s194_s28 }
   0x7   :  { %246 = vmatprep.mubr.msk.bf16.mxu0 %vm308_vm1, %v307_v2  ;;  %s259_s2 = scalar_lea.vmem %s195_s28, 256  ;;  %p264_p1 = scmp.lt.s32.totalorder %s195_s28, %s195_s28 }
   0x8   :  { %p260_p0 = scmp.ne.s32.totalorder %s195_s28, %s259_s2  ;;  %p265_p2 = scmp.lt.s32.totalorder %s259_s2, %s259_s2 }
   0xa   :  { %p266_p3 = por %p265_p2, %p264_p1 }
   0xc   :  { %p267_p4 = pnand %p266_p3, %p260_p0 }
  0xd9   :  { %v68_v6 = vpop.f32.mrb[0].mxu0 }
  0xda   :  { %v236_v7 = vpop.f32.mrb[1].mxu0 }
  0xdb   :  { %v71_v8 = vpop.f32.mrb[2].mxu0 }
  0xdc   :  { %v75_v9 = vpack.c.bf16 %v71_v8, %v68_v6  ;;  %v237_v10 = vpop.f32.mrb[3].mxu0 }
  0xde   :  { %239 = vmatpush3.bf16.msra.mxu1 %v75_v9  ;;  %139 = vrot.lane.b32.xlu0 %v75_v9, %s309_s0 }
  0xe1   :  { %241 = vmatmul.mubr.msk.bf16.vlgmr.msra.gmra.mrb[0].mxu1 %vm83_vm3, %v257_v11 }
 0x150   :  { %v140_v12 = vpop.permute.xlu0 %139 }
 0x151   :  { %245 = vmatpush3.bf16.msra.mxu0 %v140_v12 }
 0x154   :  { %247 = vmatmul.mubr.msk.bf16.vlgmr.msra.gmra.mrb[4].mxu0 %vm83_vm3, %v258_v13 }
 0x1b4   :  { %v121_v14 = vpop.f32.mrb[0].mxu1 }
 0x1b5   :  { %129 = vst.msk [vmem:[#allocation2] sm:$0xff] %vm128_vm4, %v121_v14  ;;  %v242_v15 = vpop.f32.mrb[1].mxu1 }
 0x1b6   :  { %v124_v16 = vpop.f32.mrb[2].mxu1 }
 0x1b7   :  { %130 = vst.msk [vmem:[#allocation2 + $0x8] sm:$0xff] %vm128_vm4, %v124_v16  ;;  %v243_v17 = vpop.f32.mrb[3].mxu1 }
 0x1b8   :  { %270 = shalt.err (!%p267_p4)
}
 0x1b9   :  { %s271_s30 = scalar_lea.hbm %s387_s4, 256 }
 0x1ba   :  { %p272_p5 = scmp.ne.s32.totalorder %s387_s4, %s271_s30  ;;  %p275_p6 = scmp.lt.u32.totalorder %s271_s30, %s387_s4 }
 0x1bc   :  { %p277_p7 = pnand %p275_p6, %p272_p5 }
 0x1be   :  { %280 = shalt.err (!%p277_p7)
}
 0x1bf   :  { %s311_s10 = smov 128   ;;  %s312_s11 = smov 8   ;;  %vm186_vm5 = vcmask 195584  }
 0x1c0   :  { %200 = dma.vmem_to_hbm [thread:$0]  %s195_s28, 256, %s387_s4, [#allocation3], %s311_s10, %s311_s10, %s312_s11  }
 0x1c1   :  { %s313_s14 = smov [#allocation4]  }
 0x1c2   :  { %s206_s15 = sshll.u32 %s313_s14, 4  ;;  %s207_s15 = int_to_ptr.vmem [resolvable:$true] %s206_s15 }
 0x1c3   :  { %s281_s16 = scalar_lea.vmem %s207_s15, 256  ;;  %p286_p9 = scmp.lt.s32.totalorder %s207_s15, %s207_s15 }
 0x1c4   :  { %p282_p8 = scmp.ne.s32.totalorder %s207_s15, %s281_s16  ;;  %p287_p10 = scmp.lt.s32.totalorder %s281_s16, %s281_s16 }
 0x1c6   :  { %p288_p11 = por %p287_p10, %p286_p9 }
 0x1c8   :  { %p289_p12 = pnand %p288_p11, %p282_p8 }
 0x227   :  { %v179_v18 = vpop.f32.mrb[4].mxu0 }
 0x228   :  { %187 = vst.msk [vmem:[#allocation4] sm:$0xff] %vm186_vm5, %v179_v18  ;;  %v248_v19 = vpop.f32.mrb[5].mxu0 }
 0x229   :  { %v182_v20 = vpop.f32.mrb[6].mxu0 }
 0x22a   :  { %188 = vst.msk [vmem:[#allocation4 + $0x8] sm:$0xff] %vm186_vm5, %v182_v20  ;;  %v249_v21 = vpop.f32.mrb[7].mxu0 }
 0x22b   :  { %292 = shalt.err (!%p289_p12)
}
 0x22c   :  { %s293_s4 = scalar_lea.hbm %s388_s5, 256 }
 0x22d   :  { %p294_p13 = scmp.ne.s32.totalorder %s388_s5, %s293_s4  ;;  %p297_p0 = scmp.lt.u32.totalorder %s293_s4, %s388_s5 }
 0x22f   :  { %p299_p1 = pnand %p297_p0, %p294_p13 }
 0x231   :  { %302 = shalt.err (!%p299_p1)
}
 0x232   :  { %212 = dma.vmem_to_hbm [thread:$0]  %s207_s15, 256, %s388_s5, [#allocation5], %s311_s10, %s311_s10, %s312_s11  }
 0x233   :  { %303 = dma.done.wait [#allocation3], 256  }
 0x234   :  { %304 = vsyncadd [#allocation3], 4294967040 }
 0x235   :  { %305 = dma.done.wait [#allocation5], 256  }
 0x236   :  { %306 = vsyncadd [#allocation5], 4294967040 }
 0x237   :  { %219 = vsyncpa [#allocation3], 1 }
 0x238   :  { %220 = vsyncpa [#allocation5], 1 }

</bundles_post_ra>
